<compile_context>
chip_gen: v5e
topology: v5e:2x2
jax: 0.10.0
libtpu: 0.0.40
codegen_flags: <defaults>
</compile_context>

<pallas_src>
import math

import jax
import jax.numpy as jnp
from jax import lax
from jax.experimental import pallas as pl
from jax.experimental.pallas import tpu as pltpu


# ------------------------------------------------------------------- kernel --
def _cpc_kernel(z_ref, c_ref, w_ref, b_ref, col_ref, loss_ref, acc_ref):
    # z_ref:   (Bb, T, D)      bf16 encoder outputs (full T, shift folded into indices)
    # c_ref:   (Bb, L, C)      bf16 context, pre-trimmed to L = T - K
    # w_ref:   (C, K*D)        bf16 all K predictor weights fused column-wise
    # b_ref:   (1, K*D)        f32 fused predictor biases
    # col_ref: (Bb, N+1, K*L)  int32 time-column index into the score matrix;
    #                          class 0 = positive, 1..N = negatives, k-shift folded in
    # loss_ref/acc_ref: (1, Bb, K*L)  f32, lane-dense (K*L lanes)
    Bb, L, C = c_ref.shape
    T, D = z_ref.shape[1], z_ref.shape[2]
    KD = w_ref.shape[1]
    K = KD // D
    inv_sqrt_d = 1.0 / math.sqrt(D)

    # (1) All K projections as one MXU matmul: (Bb*L, C) @ (C, K*D), f32 accum.
    c_flat = c_ref[...].reshape(Bb * L, C)
    wc = jnp.dot(c_flat, w_ref[...], preferred_element_type=jnp.float32)
    wc = (wc + b_ref[...]).reshape(Bb, L, KD)                       # (Bb, L, K*D) f32

    # (2) Stack the K step-predictions along rows (k-major, then t) -> (Bb, K*L, D).
    #     Static lane slices + sublane concat (no general 4-D transpose).
    wc_stacked = jnp.concatenate(
        [wc[:, :, k * D:(k + 1) * D] for k in range(K)], axis=1
    ).astype(z_ref.dtype)                                           # (Bb, K*L, D) bf16

    # (3) One batched score matmul against the full z block:
    #     g[b, t', k*L + t] = <z[b, t'], Wc_k[b, t]> / sqrt(D)
    g = lax.dot_general(z_ref[...], wc_stacked,
                        (((2,), (2,)), ((0,), (0,))),
                        preferred_element_type=jnp.float32) * inv_sqrt_d   # (Bb, T, K*L)

    # (4) One-hot gather of the (1 positive + N negative) logits per (k, t):
    #     f[b, j, kl] = g[b, col[b, j, kl], kl]   (gather along the sublane/T axis,
    #     result stays lane-major with K*L lanes).
    iota_t = lax.broadcasted_iota(jnp.int32, (1, 1, T, 1), 2)
    mask = col_ref[...][:, :, None, :] == iota_t                    # (Bb, N+1, T, K*L)
    f = jnp.sum(jnp.where(mask, g[:, None, :, :], 0.0), axis=2)     # (Bb, N+1, K*L)

    # (5) Stable cross-entropy with target class 0, and argmax==0 accuracy
    #     (f_pos >= max over all classes reproduces torch argmax first-index ties).
    f_pos = f[:, 0, :]                                              # (Bb, K*L)
    m = jnp.max(f, axis=1)                                          # (Bb, K*L)
    lse = m + jnp.log(jnp.sum(jnp.exp(f - m[:, None, :]), axis=1))  # (Bb, K*L)
    loss_ref[0] = lse - f_pos
    acc_ref[0] = (f_pos >= m).astype(jnp.float32)


# ------------------------------------------------------------------ wrapper --
def _choose_block_rows(B, L, target_rows=128):
    """Rows (speakers) per grid step: fill ~128 sublanes for the fused projection
    matmul while keeping the parallel grid length >= 2 (v7x second TensorCore)."""
    divisors = [d for d in range(1, B + 1) if B % d == 0]
    cand = [d for d in divisors if B // d >= 2] or divisors
    fit = [d for d in cand if d * L <= target_rows]
    return max(fit) if fit else min(cand)


def cpc_loss_same_seq(z, c, pred_w, pred_b, neg_idx, *, compute_dtype=jnp.bfloat16):
    """CPC loss with within-sequence negatives.

    z:       (B, T, z_dim)      encoder outputs
    c:       (B, T, c_dim)      context (autoregressive) outputs
    pred_w:  (K, c_dim, z_dim)  predictor weights, (in, out) layout
    pred_b:  (K, z_dim)         predictor biases
    neg_idx: (B, K, N, L) int32 within-sequence negative indices, L = T - K

    Returns (loss: scalar, accuracies: (K,) array) — matches the PyTorch forward.
    """
    B, T, D = z.shape
    K, C, _ = pred_w.shape
    L = T - K
    N = neg_idx.shape[2]
    KL = K * L
    KD = K * D

    Bb = _choose_block_rows(B, L)
    G = B // Bb

    # bf16 matmul operands (all accumulation stays f32 inside the kernel).
    z_in = z.astype(compute_dtype)
    c_in = c[:, :L, :].astype(compute_dtype)
    # Fuse the K predictors column-wise: W_all[c, k*D + d] = pred_w[k, c, d].
    w_all = jnp.transpose(pred_w, (1, 0, 2)).reshape(C, KD).astype(compute_dtype)
    b_all = pred_b.reshape(1, KD).astype(jnp.float32)

    # Gather indices: time column into the score matrix, class 0 = positive,
    # classes 1..N = negatives; the per-step shift (k+1) is folded in here.
    shifts = jnp.arange(1, K + 1, dtype=jnp.int32)
    pos_col = (shifts[:, None] + jnp.arange(L, dtype=jnp.int32)[None, :]).reshape(1, 1, KL)
    pos_col = jnp.broadcast_to(pos_col, (B, 1, KL))
    neg_col = neg_idx.astype(jnp.int32) + shifts[None, :, None, None]          # (B, K, N, L)
    neg_col = jnp.transpose(neg_col, (0, 2, 1, 3)).reshape(B, N, KL)           # (B, N, K*L)
    col = jnp.concatenate([pos_col, neg_col], axis=1)                          # (B, N+1, K*L)

    loss_terms, acc_terms = pl.pallas_call(
        _cpc_kernel,
        grid=(G,),
        in_specs=[
            pl.BlockSpec((Bb, T, D), lambda g: (g, 0, 0)),
            pl.BlockSpec((Bb, L, C), lambda g: (g, 0, 0)),
            pl.BlockSpec((C, KD), lambda g: (0, 0)),          # weights stay resident
            pl.BlockSpec((1, KD), lambda g: (0, 0)),
            pl.BlockSpec((Bb, N + 1, KL), lambda g: (g, 0, 0)),
        ],
        out_specs=(
            pl.BlockSpec((1, Bb, KL), lambda g: (g, 0, 0)),   # lane-dense (K*L lanes)
            pl.BlockSpec((1, Bb, KL), lambda g: (g, 0, 0)),
        ),
        out_shape=(
            jax.ShapeDtypeStruct((G, Bb, KL), jnp.float32),
            jax.ShapeDtypeStruct((G, Bb, KL), jnp.float32),
        ),
        compiler_params=pltpu.CompilerParams(
            dimension_semantics=("parallel",)),
    )(z_in, c_in, w_all, b_all, col)

    # Trivial finalization (B*K*L elements): per-step means, then mean over steps.
    loss_terms = loss_terms.reshape(B, K, L)
    acc_terms = acc_terms.reshape(B, K, L)
    loss_per_k = jnp.mean(loss_terms, axis=(0, 2))      # (K,)
    acc_per_k = jnp.mean(acc_terms, axis=(0, 2))        # (K,)
    return jnp.mean(loss_per_k), acc_per_k


def sample_negative_indices(key, B, K, N, L):
    """Same distribution as the PyTorch module: (randint(1, L) + arange(L)) % L."""
    # TODO(synk): torch.randint RNG stream cannot be matched bitwise; distribution-equivalent.
    r = jax.random.randint(key, (B, K, N, L), 1, L, dtype=jnp.int32)
    return (r + jnp.arange(L, dtype=jnp.int32)[None, None, None, :]) % L


# ---------------------------------------------------------------- reference --
def _cpc_reference(z, c, pred_w, pred_b, neg_idx, compute_dtype=jnp.float32):
    """Pure-JAX reference mirroring the module; matmul operands rounded to
    compute_dtype (like the kernel), all accumulation in f32."""
    f32 = jnp.float32
    B, T, D = z.shape
    K = pred_w.shape[0]
    L = T - K
    z = z.astype(compute_dtype).astype(f32)
    c_t = c[:, :L, :].astype(compute_dtype).astype(f32)
    w = pred_w.astype(compute_dtype).astype(f32)
    barange = jnp.arange(B)[:, None, None]
    losses, accs = [], []
    for kk in range(K):
        shift = kk + 1
        z_shift = z[:, shift:shift + L, :]                                  # (B, L, D)
        wc = jnp.einsum("blc,cd->bld", c_t, w[kk],
                        precision=lax.Precision.HIGHEST) + pred_b[kk]       # (B, L, D)
        wc = wc.astype(compute_dtype).astype(f32)       # kernel rounds Wc before the score matmul
        z_neg = z_shift[barange, neg_idx[:, kk], :]                         # (B, N, L, D)
        zs = jnp.concatenate([z_shift[:, None], z_neg], axis=1)             # (B, 1+N, L, D)
        f = jnp.sum(zs * wc[:, None] / math.sqrt(D), axis=-1)               # (B, 1+N, L)
        lse = jax.nn.logsumexp(f, axis=1)                                   # (B, L)
        losses.append(jnp.mean(lse - f[:, 0]))
        accs.append(jnp.mean((jnp.argmax(f, axis=1) == 0).astype(jnp.float32)))
    return jnp.mean(jnp.stack(losses)), jnp.stack(accs)


# --------------------------------------------------------------------- main --
if __name__ == "__main__":
    B, T = 4, 36                      # n_speakers_per_batch, z.size(1)
    z_dim, c_dim = 32, 64
    n_prediction_steps, n_negatives = 4, 8
    L = T - n_prediction_steps

    key = jax.random.PRNGKey(0)
    kz, kc, kw, kb, ki = jax.random.split(key, 5)
    z = jax.random.normal(kz, (B, T, z_dim), jnp.float32)
    c = jax.random.normal(kc, (B, T, c_dim), jnp.float32)
    pred_w = 0.1 * jax.random.normal(kw, (n_prediction_steps, c_dim, z_dim), jnp.float32)
    pred_b = 0.05 * jax.random.normal(kb, (n_prediction_steps, z_dim), jnp.float32)
    neg_idx = sample_negative_indices(ki, B, n_prediction_steps, n_negatives, L)

    loss, accs = cpc_loss_same_seq(z, c, pred_w, pred_b, neg_idx)
    jax.block_until_ready((loss, accs))

    ref_loss, ref_accs = _cpc_reference(z, c, pred_w, pred_b, neg_idx,
                                        compute_dtype=jnp.bfloat16)

    assert loss.shape == () and accs.shape == (n_prediction_steps,)
    assert bool(jnp.isfinite(loss)) and bool(jnp.all(jnp.isfinite(accs)))
    assert bool(jnp.all((accs >= 0.0) & (accs <= 1.0)))
    assert bool(jnp.allclose(loss, ref_loss, rtol=2e-3, atol=2e-3))
    assert bool(jnp.allclose(accs, ref_accs, atol=1.0 / (B * L) + 1e-6))

    accuracies = [float(a) for a in accs]   # module returns accuracies as a Python list
    print("KERNEL_OK")
</pallas_src>

<mosaic_0001>
module attributes {stable_mosaic.version = 11 : i64} {
  func.func @_cpc_kernel(%arg0: i32, %arg1: memref<2x36x32xbf16, #tpu.memory_space<vmem>>, %arg2: memref<2x32x64xbf16, #tpu.memory_space<vmem>>, %arg3: memref<64x128xbf16, #tpu.memory_space<vmem>>, %arg4: memref<1x128xf32, #tpu.memory_space<vmem>>, %arg5: memref<2x9x128xi32, #tpu.memory_space<vmem>>, %arg6: memref<1x2x128xf32, #tpu.memory_space<vmem>>, %arg7: memref<1x2x128xf32, #tpu.memory_space<vmem>>) attributes {dimension_semantics = [#tpu.dimension_semantics<parallel>], iteration_bounds = array<i64: 2>, scalar_prefetch = 0 : i64, scratch_operands = 0 : i64, tpu.core_type = #tpu.core_type<tc>, window_params = [{transform_indices = @transform_0, window_bounds = array<i64: 2, 36, 32>}, {transform_indices = @transform_1, window_bounds = array<i64: 2, 32, 64>}, {pipeline_mode = #tpu.pipeline_mode<synchronous>, transform_indices = @transform_2, window_bounds = array<i64: 64, 128>}, {pipeline_mode = #tpu.pipeline_mode<synchronous>, transform_indices = @transform_3, window_bounds = array<i64: 1, 128>}, {transform_indices = @transform_4, window_bounds = array<i64: 2, 9, 128>}, {transform_indices = @transform_5, window_bounds = array<i64: 1, 2, 128>}, {transform_indices = @transform_6, window_bounds = array<i64: 1, 2, 128>}]} {
    %c0 = arith.constant 0 : index
    %c0_0 = arith.constant 0 : index
    %c0_1 = arith.constant 0 : index
    %0 = vector.load %arg2[%c0, %c0_0, %c0_1] : memref<2x32x64xbf16, #tpu.memory_space<vmem>>, vector<2x32x64xbf16>
    %1 = vector.shape_cast %0 : vector<2x32x64xbf16> to vector<64x64xbf16>
    %c0_2 = arith.constant 0 : index
    %c0_3 = arith.constant 0 : index
    %2 = vector.load %arg3[%c0_2, %c0_3] : memref<64x128xbf16, #tpu.memory_space<vmem>>, vector<64x128xbf16>
    %cst = arith.constant dense<0.000000e+00> : vector<64x128xf32>
    %3 = tpu.matmul %1, %2, %cst {dimension_numbers = #tpu.dot_dimension_numbers<[1], [0], [0], [1], [0, 0, 1, 1], [], []>} : vector<64x64xbf16>, vector<64x128xbf16>, vector<64x128xf32> -> vector<64x128xf32>
    %c0_4 = arith.constant 0 : index
    %c0_5 = arith.constant 0 : index
    %4 = vector.load %arg4[%c0_4, %c0_5] : memref<1x128xf32, #tpu.memory_space<vmem>>, vector<1x128xf32>
    %5 = vector.broadcast %4 : vector<1x128xf32> to vector<64x128xf32>
    %6 = arith.addf %3, %5 : vector<64x128xf32>
    %7 = vector.shape_cast %6 : vector<64x128xf32> to vector<2x32x128xf32>
    %8 = vector.extract_strided_slice %7 {offsets = [0, 0, 0], sizes = [2, 32, 32], strides = [1, 1, 1]} : vector<2x32x128xf32> to vector<2x32x32xf32>
    %9 = vector.extract_strided_slice %7 {offsets = [0, 0, 32], sizes = [2, 32, 32], strides = [1, 1, 1]} : vector<2x32x128xf32> to vector<2x32x32xf32>
    %10 = vector.extract_strided_slice %7 {offsets = [0, 0, 64], sizes = [2, 32, 32], strides = [1, 1, 1]} : vector<2x32x128xf32> to vector<2x32x32xf32>
    %11 = vector.extract_strided_slice %7 {offsets = [0, 0, 96], sizes = [2, 32, 32], strides = [1, 1, 1]} : vector<2x32x128xf32> to vector<2x32x32xf32>
    %12 = tpu.concatenate %8, %9, %10, %11 in 1 : vector<2x32x32xf32>, vector<2x32x32xf32>, vector<2x32x32xf32>, vector<2x32x32xf32> -> vector<2x128x32xf32>
    %13 = arith.truncf %12 : vector<2x128x32xf32> to vector<2x128x32xbf16>
    %c0_6 = arith.constant 0 : index
    %c0_7 = arith.constant 0 : index
    %c0_8 = arith.constant 0 : index
    %14 = vector.load %arg1[%c0_6, %c0_7, %c0_8] : memref<2x36x32xbf16, #tpu.memory_space<vmem>>, vector<2x36x32xbf16>
    %cst_9 = arith.constant dense<0.000000e+00> : vector<2x36x128xf32>
    %15 = tpu.matmul %14, %13, %cst_9 {dimension_numbers = #tpu.dot_dimension_numbers<[2], [2], [1], [1], [0, 0, 0, 1, 1, 1], [0], [0]>} : vector<2x36x32xbf16>, vector<2x128x32xbf16>, vector<2x36x128xf32> -> vector<2x36x128xf32>
    %cst_10 = arith.constant 0.176776692 : f32
    %16 = vector.broadcast %cst_10 : f32 to vector<2x36x128xf32>
    %17 = arith.mulf %15, %16 : vector<2x36x128xf32>
    %18 = tpu.iota {dimensions = array<i32: 2>} : vector<1x1x36x1xi32>
    %c0_11 = arith.constant 0 : index
    %c0_12 = arith.constant 0 : index
    %c0_13 = arith.constant 0 : index
    %19 = vector.load %arg5[%c0_11, %c0_12, %c0_13] : memref<2x9x128xi32, #tpu.memory_space<vmem>>, vector<2x9x128xi32>
    %20 = vector.shape_cast %19 : vector<2x9x128xi32> to vector<2x9x1x128xi32>
    %21 = vector.broadcast %20 : vector<2x9x1x128xi32> to vector<2x9x36x128xi32>
    %22 = vector.broadcast %18 : vector<1x1x36x1xi32> to vector<2x9x36x128xi32>
    %23 = arith.cmpi eq, %21, %22 : vector<2x9x36x128xi32>
    %24 = vector.shape_cast %17 : vector<2x36x128xf32> to vector<2x1x36x128xf32>
    %cst_14 = arith.constant 0.000000e+00 : f32
    %25 = vector.shape_cast %24 : vector<2x1x36x128xf32> to vector<2x1x36x128xf32>
    %26 = vector.broadcast %25 : vector<2x1x36x128xf32> to vector<2x9x36x128xf32>
    %27 = vector.broadcast %cst_14 : f32 to vector<2x9x36x128xf32>
    %28 = arith.select %23, %26, %27 : vector<2x9x36x128xi1>, vector<2x9x36x128xf32>
    %cst_15 = arith.constant dense<0.000000e+00> : vector<2x9x128xf32>
    %29 = vector.multi_reduction <add>, %28, %cst_15 [2] : vector<2x9x36x128xf32> to vector<2x9x128xf32>
    %30 = vector.extract_strided_slice %29 {offsets = [0, 0, 0], sizes = [2, 1, 128], strides = [1, 1, 1]} : vector<2x9x128xf32> to vector<2x1x128xf32>
    %31 = vector.shape_cast %30 : vector<2x1x128xf32> to vector<2x128xf32>
    %cst_16 = arith.constant dense<0xFF800000> : vector<2x128xf32>
    %32 = vector.multi_reduction <maximumf>, %29, %cst_16 [1] : vector<2x9x128xf32> to vector<2x128xf32>
    %33 = vector.shape_cast %32 : vector<2x128xf32> to vector<2x1x128xf32>
    %34 = vector.broadcast %33 : vector<2x1x128xf32> to vector<2x9x128xf32>
    %35 = arith.subf %29, %34 : vector<2x9x128xf32>
    %36 = math.exp %35 : vector<2x9x128xf32>
    %cst_17 = arith.constant dense<0.000000e+00> : vector<2x128xf32>
    %37 = vector.multi_reduction <add>, %36, %cst_17 [1] : vector<2x9x128xf32> to vector<2x128xf32>
    %38 = math.log %37 : vector<2x128xf32>
    %39 = arith.addf %32, %38 : vector<2x128xf32>
    %40 = arith.subf %39, %31 : vector<2x128xf32>
    %c0_18 = arith.constant 0 : index
    %c0_19 = arith.constant 0 : index
    %c0_20 = arith.constant 0 : index
    %41 = vector.load %arg6[%c0_18, %c0_19, %c0_20] : memref<1x2x128xf32, #tpu.memory_space<vmem>>, vector<1x2x128xf32>
    %42 = vector.shape_cast %41 : vector<1x2x128xf32> to vector<2x128xf32>
    %43 = vector.shape_cast %40 : vector<2x128xf32> to vector<1x2x128xf32>
    tpu.vector_store %arg6[%c0_18, %c0_19, %c0_20], %43 {strides = array<i32>} : memref<1x2x128xf32, #tpu.memory_space<vmem>>, vector<1x2x128xf32>,
    %44 = arith.cmpf oge, %31, %32 : vector<2x128xf32>
    %45 = arith.extui %44 : vector<2x128xi1> to vector<2x128xi32>
    %46 = arith.sitofp %45 : vector<2x128xi32> to vector<2x128xf32>
    %c0_21 = arith.constant 0 : index
    %c0_22 = arith.constant 0 : index
    %c0_23 = arith.constant 0 : index
    %47 = vector.load %arg7[%c0_21, %c0_22, %c0_23] : memref<1x2x128xf32, #tpu.memory_space<vmem>>, vector<1x2x128xf32>
    %48 = vector.shape_cast %47 : vector<1x2x128xf32> to vector<2x128xf32>
    %49 = vector.shape_cast %46 : vector<2x128xf32> to vector<1x2x128xf32>
    tpu.vector_store %arg7[%c0_21, %c0_22, %c0_23], %49 {strides = array<i32>} : memref<1x2x128xf32, #tpu.memory_space<vmem>>, vector<1x2x128xf32>,
    return
  }
  func.func @transform_0(%arg0: i32) -> (i32, i32, i32) {
    %c0_i32 = arith.constant 0 : i32
    %c0_i32_0 = arith.constant 0 : i32
    %c0_i32_1 = arith.constant 0 : i32
    return %arg0, %c0_i32, %c0_i32_0 : i32, i32, i32
  }
  func.func @transform_1(%arg0: i32) -> (i32, i32, i32) {
    %c0_i32 = arith.constant 0 : i32
    %c0_i32_0 = arith.constant 0 : i32
    %c0_i32_1 = arith.constant 0 : i32
    return %arg0, %c0_i32, %c0_i32_0 : i32, i32, i32
  }
  func.func @transform_2(%arg0: i32) -> (i32, i32) {
    %c0_i32 = arith.constant 0 : i32
    %c0_i32_0 = arith.constant 0 : i32
    %c0_i32_1 = arith.constant 0 : i32
    return %c0_i32, %c0_i32_0 : i32, i32
  }
  func.func @transform_3(%arg0: i32) -> (i32, i32) {
    %c0_i32 = arith.constant 0 : i32
    %c0_i32_0 = arith.constant 0 : i32
    %c0_i32_1 = arith.constant 0 : i32
    return %c0_i32, %c0_i32_0 : i32, i32
  }
  func.func @transform_4(%arg0: i32) -> (i32, i32, i32) {
    %c0_i32 = arith.constant 0 : i32
    %c0_i32_0 = arith.constant 0 : i32
    %c0_i32_1 = arith.constant 0 : i32
    return %arg0, %c0_i32, %c0_i32_0 : i32, i32, i32
  }
  func.func @transform_5(%arg0: i32) -> (i32, i32, i32) {
    %c0_i32 = arith.constant 0 : i32
    %c0_i32_0 = arith.constant 0 : i32
    %c0_i32_1 = arith.constant 0 : i32
    return %arg0, %c0_i32, %c0_i32_0 : i32, i32, i32
  }
  func.func @transform_6(%arg0: i32) -> (i32, i32, i32) {
    %c0_i32 = arith.constant 0 : i32
    %c0_i32_0 = arith.constant 0 : i32
    %c0_i32_1 = arith.constant 0 : i32
    return %arg0, %c0_i32, %c0_i32_0 : i32, i32, i32
  }
}

</mosaic_0001>

<bundles_post_ra>
// kernel: tpu_custom_call.1
= control target key start
LH: loop header
LB: loop body
LE: loop exit
PB: predicated region body
PF: predicated region fallthrough
CT: control target
= control target key end

     0   :  { %12 = vsyncpa [#allocation3], 0  ;;  %s2999_s0 = inlined_call_operand.vmem [shape: bf16[4,36,32], index: 0, kind: input, shape index: {}]   ;;  %s3000_s1 = inlined_call_operand.vmem [shape: bf16[4,32,64], index: 1, kind: input, shape index: {}]   ;;  %s3001_s2 = inlined_call_operand.vmem [shape: bf16[64,128], index: 2, kind: input, shape index: {}]   ;;  %s3002_s3 = inlined_call_operand.vmem [shape: f32[1,128], index: 3, kind: input, shape index: {}]   ;;  %s3003_s4 = inlined_call_operand.vmem [shape: s32[4,9,128], index: 4, kind: input, shape index: {}]   ;;  %s3004_s5 = inlined_call_operand.hbm [shape: f32[2,2,128], index: 5, kind: output, shape index: {0}]   ;;  %s3005_s6 = inlined_call_operand.hbm [shape: f32[2,2,128], index: 6, kind: output, shape index: {1}]  }
   0x1   :  { %14 = vsyncpa [#allocation3 + $0x1], 0 }
   0x2   :  { %15 = vsyncpa [#allocation5], 0 }
   0x3   :  { %17 = vsyncpa [#allocation5 + $0x1], 0  ;;  %s1912_s21 = smov 0   ;;  %s1914_s22 = smov 0  }
   0x4   :  { %s1916_s23 = smov 0   ;;  %s1918_s24 = smov 0  }
   0x5 LB: > { %s1514_s25 = sadd.s32 4294967295, %s1871_s24   ;;  %s1515_s26 = sadd.s32 4294967294, %s1871_s24   ;;  %s1871_s24 = sphi %s1918_s24, %s3130_s24   ;;  %s1867_s23 = sphi %s1916_s23, %s3129_s23   ;;  %s1863_s22 = sphi %s1914_s22, %s3128_s22   ;;  %s1859_s21 = sphi %s1912_s21, %s3127_s21  }
   0x6   : > { %s1935_s27 = sadd.s32 1, %s1871_s24   ;;  %s150_s28 = sadd.s32 1, %s1867_s23 }
   0x7   : > { %s147_s29 = ssub.s32 %s1871_s24, %s1935_s27  ;;  %p160_p0 = scmp.ne.s32.totalorder %s1867_s23, %s1863_s22 }
   0x8   : > { %p148_p1 = scmp.eq.s32.totalorder %s147_s29, 0  ;;  %p161_p2 = scmp.eq.s32.totalorder %s1514_s25, 1 }
   0x9   : > { %p166_p3 = scmp.ne.s32.totalorder %s1863_s22, %s1859_s21  ;;  %p167_p4 = scmp.eq.s32.totalorder %s1515_s26, 1 }
   0xa   : > { %s1945_s30 = scalar_select %p148_p1, %s1867_s23, %s150_s28  }
   0xb   : > { %p1947_p5 = por %p161_p2, %p160_p0  ;;  %p1951_p6 = por %p167_p4, %p166_p3 }
   0xc   : > { %p1518_p7 = scmp.ge.s32.totalorder %s1871_s24, 1  ;;  %p247_p8 = scmp.lt.s32.totalorder %s1871_s24, 3 }
   0xe   : > { %p248_p9 = pnand %p1518_p7, %p247_p8 }
  0x10   : > { %251 = sbr.rel (%p248_p9) target bundleno = 703 (0x2bf), region = 40 }
  0x15   : > { %v1604_v0 = vld [vmem:[%s3001_s2 + $0x18] sm:$0xff]  ;;  %s1960_s11 = sshll.u32 %s1514_s25, 1  ;;  %v1603_v1 = vld [vmem:[%s3001_s2 + $0x10] sm:$0xff]  ;;  %v1602_v2 = vld [vmem:[%s3001_s2 + $0x8] sm:$0xff]  ;;  %vm381_vm0 = vcmask 523264   ;;  %s1873_s13 = smov 32  }
  0x16   : > { %p296_p10 = scmp.lt.s32.totalorder %s1960_s11, 3  ;;  %398 = vmatpush.bf16.msra.mxu0 %v1604_v0  ;;  %v1601_v3 = vld [vmem:[%s3001_s2] sm:$0xff]  ;;  %s1875_s16 = smov 96   ;;  %vm598_vm1 = vcmask 261120  }
  0x17   : > { %v1736_v9 = vld [vmem:[%s3002_s3] ss:$0 sm:$0xff]  ;;  %s1394_s29 = scalar_lea.hbm %s3005_s6, %s1960_s11  ;;  %s1797_s19 = scalar_lea.hbm %s3005_s6, 4 }
  0x18   : > { %s1967_s14 = scalar_select %p296_p10, %s1960_s11, 3 }
  0x19   : > { %s2920_s12 = sshll.u32 %s1394_s29, 4  ;;  %s1399_s12 = int_to_ptr.hbm [resolvable:$true] %s2920_s12 }
  0x1a   : > { %s1595_s15 = sshll.u32 %s1967_s14, 4  ;;  %399 = vmatpush.bf16.msra.mxu0 %v1603_v1  ;;  %s1625_s17 = smul.u32 20, %s1967_s14 }
  0x1b   : > { %s1976_s20 = scalar_lea.vmem %s3003_s4, %s1595_s15  ;;  %s307_s9 = scalar_lea.vmem %s3000_s1, %s1595_s15 }
  0x1c   : > { %v1597_v4 = vld [vmem:[%s307_s9] sm:$0xff]  ;;  %v1598_v5 = vld [vmem:[%s307_s9 + $0x8] sm:$0xff]  ;;  %v1599_v6 = vld [vmem:[%s307_s9 + $0x10] sm:$0xff]  ;;  %s1874_s15 = smov 64   ;;  %s300_s25 = scalar_lea.vmem %s2999_s0, %s1625_s17 }
  0x1d   : > { %v1600_v7 = vld [vmem:[%s307_s9 + $0x18] sm:$0xff]  ;;  %s2884_s14 = sand.u32 1, %s1863_s22  }
  0x1e   : > { %400 = vmatpush.bf16.msra.mxu0 %v1602_v2 }
  0x22   : > { %401 = vmatpush.bf16.msra.mxu0 %v1601_v3 }
  0x25   : > { %1561 = vmatmul.msk.bf16.vlgmr.msra.gmra.mxu0 %vm381_vm0, %v1597_v4 }
  0x35   : > { %1562 = vmatmul.msk.bf16.gmra.mxu0 %vm381_vm0, %v1598_v5 }
  0x45   : > { %1563 = vmatmul.msk.bf16.gmra.mxu0 %vm381_vm0, %v1599_v6 }
  0x55   : > { %1564 = vmatmul.msk.bf16.gmra.mxu0 %vm381_vm0, %v1600_v7 }
  0xa2   : > { %v403_v8 = vpop.f32.mrf.mxu0 }
  0xa3   : > { %v404_v10 = vadd.f32 %v1736_v9, %v403_v8 }
  0xa5   : > { %v503_v13 = vpack.c.bf16 %v404_v10, %v404_v10 }
  0xa7   : > { %v1987_v15 = vunpack.c.l.b16 %v503_v13 }
  0xaa   : > { %v405_v11 = vpop.f32.mrf.mxu0 }
  0xab   : > { %v406_v12 = vadd.f32 %v1736_v9, %v405_v11 }
  0xad   : > { %v504_v14 = vpack.c.bf16 %v406_v12, %v406_v12  ;;  %v1689_v38 = vpack.i.bf16 %v406_v12, %v404_v10 }
  0xaf   : > { %v1989_v16 = vunpack.c.l.b16 %v504_v14 }
  0xb1   : > { %v590_v17 = vpack.c.b16 %v1989_v16, %v1987_v15  ;;  %v539_v15 = vld [vmem:[%s300_s25 + $0x10] sm:$0x3] }
  0xb2   : > { %v408_v18 = vpop.f32.mrf.mxu0  ;;  %v554_v16 = vunpack.c.l.b16 %v539_v15 }
  0xb3   : > { %v409_v19 = vadd.f32 %v1736_v9, %v408_v18 }
  0xb5   : > { %v505_v22 = vpack.c.bf16 %v409_v19, %v409_v19 }
  0xb7   : > { %v1993_v24 = vunpack.c.l.b16 %v505_v22 }
  0xba   : > { %v410_v20 = vpop.f32.mrf.mxu0 }
  0xbb   : > { %v411_v21 = vadd.f32 %v1736_v9, %v410_v20 }
  0xbd   : > { %v506_v23 = vpack.c.bf16 %v411_v21, %v411_v21  ;;  %v1699_v48 = vpack.i.bf16 %v411_v21, %v409_v19 }
  0xbf   : > { %v1995_v25 = vunpack.c.l.b16 %v506_v23 }
  0xc1   : > { %v591_v26 = vpack.c.b16 %v1995_v25, %v1993_v24  ;;  %v609_v24 = vsel %vm598_vm1, %v590_v17, 0  ;;  %v1605_v25 = vld [vmem:[%s300_s25] sm:$0xff]  ;;  %v557_v17 = vpack.c.b16 %v554_v16, %v554_v16 }
  0xc2   : > { %v413_v27 = vpop.f32.mrf.mxu0 }
  0xc3   : > { %v414_v28 = vadd.f32 %v1736_v9, %v413_v27 }
  0xc5   : > { %v519_v31 = vpack.c.bf16 %v414_v28, %v414_v28 }
  0xc7   : > { %v1999_v34 = vunpack.c.l.b16 %v519_v31 }
  0xca   : > { %v415_v29 = vpop.f32.mrf.mxu0 }
  0xcb   : > { %v416_v30 = vadd.f32 %v1736_v9, %v415_v29 }
  0xcd   : > { %v1684_v32 = vpack.i.bf16 %v416_v30, %v414_v28  ;;  %v520_v33 = vpack.c.bf16 %v416_v30, %v416_v30 }
  0xcf   : > { %1685 = vrot.lane.b32.xlu1 %v1684_v32, %s1873_s13  ;;  %v2001_v35 = vunpack.c.l.b16 %v520_v33 }
  0xd1   : > { %v700_v36 = vpack.c.b16 %v2001_v35, %v1999_v34  ;;  %v544_v34 = vld [vmem:[%s300_s25 + $0x24] sm:$0x3] }
  0xd2   : > { %v418_v37 = vpop.f32.mrf.mxu0  ;;  %v664_v35 = vunpack.c.l.b16 %v544_v34 }
  0xd3   : > { %v419_v39 = vadd.f32 %v1736_v9, %v418_v37 }
  0xd5   : > { %v521_v42 = vpack.c.bf16 %v419_v39, %v419_v39 }
  0xd7   : > { %1690 = vrot.lane.b32.xlu1 %v1689_v38, %s1873_s13  ;;  %v2005_v45 = vunpack.c.l.b16 %v521_v42 }
  0xda   : > { %v420_v40 = vpop.f32.mrf.mxu0 }
  0xdb   : > { %v421_v41 = vadd.f32 %v1736_v9, %v420_v40 }
  0xdd   : > { %v1694_v43 = vpack.i.bf16 %v421_v41, %v419_v39  ;;  %v522_v44 = vpack.c.bf16 %v421_v41, %v421_v41 }
  0xdf   : > { %1695 = vrot.lane.b32.xlu2 %v1694_v43, %s1874_s15  ;;  %1675 = vrot.lane.b32.xlu0 %v1694_v43, %s1873_s13  ;;  %v2007_v46 = vunpack.c.l.b16 %v522_v44 }
  0xe0   : > { %1710 = vrot.lane.b32.xlu1 %v1689_v38, %s1874_s15 }
  0xe1   : > { %v701_v47 = vpack.c.b16 %v2007_v46, %v2005_v45  ;;  %v1608_v45 = vld [vmem:[%s300_s25 + $0x1c] sm:$0xff]  ;;  %v1607_v46 = vld [vmem:[%s300_s25 + $0x14] sm:$0xff] }
  0xe7   : > { %1700 = vrot.lane.b32.xlu2 %v1699_v48, %s1874_s15  ;;  %1680 = vrot.lane.b32.xlu0 %v1699_v48, %s1873_s13  ;;  %s1370_s13 = scalar_lea.sflag [#allocation5], %s2884_s14 }
  0xe8   : > { %1725 = vrot.lane.b32.xlu1 %v1684_v32, %s1875_s16 }
  0xef   : > { %1715 = vrot.lane.b32.xlu2 %v1694_v43, %s1875_s16  ;;  %1705 = vrot.lane.b32.xlu0 %v1684_v32, %s1874_s15  ;;  %s1791_s15 = sshra.s32 %s1399_s12, 4  ;;  %s1792_s15 = int_to_ptr.hbm [resolvable:$true] %s1791_s15 }
  0xf0   : > { %p1798_p0 = scmp.lt.s32.totalorder %s1792_s15, %s3005_s6 }
  0xf7   : > { %1720 = vrot.lane.b32.xlu0 %v1699_v48, %s1875_s16  ;;  %1730 = vrot.lane.b32.xlu2 %v1689_v38, %s1875_s16  ;;  %s1793_s16 = scalar_lea.hbm %s1792_s15, 2 }
  0xf8   : > { %p1794_p11 = scmp.ne.s32.totalorder %s1792_s15, %s1793_s16  ;;  %p1799_p1 = scmp.lt.s32.totalorder %s1797_s19, %s1793_s16 }
  0xfa   : > { %p1795_p12 = pnand %p1794_p11, %p1947_p5  ;;  %p1800_p2 = por %p1799_p1, %p1798_p0 }
  0xfc   : > { %p1796_p13 = pneg %p1795_p12 }
  0xfe   : > { %p1801_p3 = pnand %p1800_p2, %p1796_p13 }
 0x139   : > { %v1696_v51 = vpop.permute.xlu2 %1695 }
 0x13a   : > { %v1698_v0 = vunpack.i.h.bf16 %v1696_v51  ;;  %v1697_v7 = vunpack.i.l.bf16 %v1696_v51 }
 0x13c   : > { %v530_v13 = vpack.c.bf16 %v1698_v0, %v1698_v0  ;;  %v529_v21 = vpack.c.bf16 %v1697_v7, %v1697_v7 }
 0x13e   : > { %v695_v30 = vunpack.c.l.b16 %v530_v13  ;;  %v694_v37 = vunpack.c.l.b16 %v529_v21 }
 0x140   : > { %v705_v51 = vpack.c.b16 %v695_v30, %v694_v37 }
 0x141   : > { %v1686_v49 = vpop.permute.xlu1 %1685  ;;  %v1701_v10 = vpop.permute.xlu2 %1700 }
 0x142   : > { %v1688_v54 = vunpack.i.h.bf16 %v1686_v49  ;;  %v1687_v55 = vunpack.i.l.bf16 %v1686_v49  ;;  %v1703_v27 = vunpack.i.h.bf16 %v1701_v10  ;;  %v1702_v28 = vunpack.i.l.bf16 %v1701_v10 }
 0x144   : > { %v532_v61 = vpack.c.bf16 %v1688_v54, %v1688_v54  ;;  %v531_v62 = vpack.c.bf16 %v1687_v55, %v1687_v55  ;;  %v514_v41 = vpack.c.bf16 %v1703_v27, %v1703_v27  ;;  %v513_v42 = vpack.c.bf16 %v1702_v28, %v1702_v28 }
 0x146   : > { %v697_v8 = vunpack.c.l.b16 %v532_v61  ;;  %v696_v9 = vunpack.c.l.b16 %v531_v62  ;;  %v733_v61 = vsel %vm598_vm1, %v705_v51, 0 }
 0x148   : > { %v706_v22 = vpack.c.b16 %v697_v8, %v696_v9 }
 0x149   : > { %v1691_v58 = vpop.permute.xlu1 %1690  ;;  %v1716_v43 = vpop.permute.xlu2 %1715 }
 0x14a   : > { %v1693_v1 = vunpack.i.h.bf16 %v1691_v58  ;;  %v1692_v3 = vunpack.i.l.bf16 %v1691_v58  ;;  %v736_v40 = vsel %vm598_vm1, %v706_v22, 0  ;;  %v1718_v54 = vunpack.i.h.bf16 %v1716_v43 }
 0x14b   : > { %v1717_v58 = vunpack.i.l.bf16 %v1716_v43 }
 0x14c   : > { %v516_v14 = vpack.c.bf16 %v1693_v1, %v1693_v1  ;;  %v515_v18 = vpack.c.bf16 %v1692_v3, %v1692_v3  ;;  %v526_v62 = vpack.c.bf16 %v1718_v54, %v1718_v54  ;;  %v612_v54 = vsel %vm598_vm1, %v591_v26, 0  ;;  %v1606_v26 = vld [vmem:[%s300_s25 + $0x8] sm:$0xff] }
 0x14e   : > { %v587_v31 = vunpack.c.l.b16 %v516_v14  ;;  %v586_v32 = vunpack.c.l.b16 %v515_v18 }
 0x150   : > { %v596_v48 = vpack.c.b16 %v587_v31, %v586_v32 }
 0x151   : > { %v1676_v50 = vpop.permute.xlu0 %1675 }
 0x152   : > { %v1678_v52 = vunpack.i.h.bf16 %v1676_v50  ;;  %v1677_v53 = vunpack.i.l.bf16 %v1676_v50  ;;  %v1711_v44 = vpop.permute.xlu1 %1710 }
 0x153   : > { %v1713_v55 = vunpack.i.h.bf16 %v1711_v44 }
 0x154   : > { %v534_v56 = vpack.c.bf16 %v1678_v52, %v1678_v52  ;;  %v533_v57 = vpack.c.bf16 %v1677_v53, %v1677_v53  ;;  %v585_v52 = vunpack.c.l.b16 %v514_v41  ;;  %v584_v53 = vunpack.c.l.b16 %v513_v42 }
 0x155   : > { %v512_v0 = vpack.c.bf16 %v1713_v55, %v1713_v55  ;;  %v718_v55 = vsel %vm598_vm1, %v700_v36, 0  ;;  %v667_v36 = vpack.c.b16 %v664_v35, %v664_v35 }
 0x156   : > { %v699_v59 = vunpack.c.l.b16 %v534_v56  ;;  %v698_v60 = vunpack.c.l.b16 %v533_v57  ;;  %v1712_v56 = vunpack.i.l.bf16 %v1711_v44  ;;  %v627_v57 = vsel %vm598_vm1, %v596_v48, 0 }
 0x157   : > { %v583_v8 = vunpack.c.l.b16 %v512_v0 }
 0x158   : > { %v707_v63 = vpack.c.b16 %v699_v59, %v698_v60  ;;  %v511_v1 = vpack.c.bf16 %v1712_v56, %v1712_v56 }
 0x159   : > { %v1681_v2 = vpop.permute.xlu0 %1680 }
 0x15a   : > { %v1683_v4 = vunpack.i.h.bf16 %v1681_v2  ;;  %v1682_v5 = vunpack.i.l.bf16 %v1681_v2  ;;  %v739_v6 = vsel %vm598_vm1, %v707_v63, 0  ;;  %v595_v63 = vpack.c.b16 %v585_v52, %v584_v53 }
 0x15b   : > { %741 = vmatpush.bf16.xpose.msrb.mxu0 %v739_v6  ;;  %1617 = vmatpush.bf16.xpose.msra.mxu2 %v739_v6  ;;  %v525_v2 = vpack.c.bf16 %v1717_v58, %v1717_v58  ;;  %v691_v6 = vunpack.c.l.b16 %v526_v62  ;;  %v582_v9 = vunpack.c.l.b16 %v511_v1  ;;  %v721_v53 = vsel %vm598_vm1, %v701_v47, 0  ;;  %v782_v58 = vld [vmem:[%s1976_s20 + $0x10] sm:$0xff] }
 0x15c   : > { %v518_v11 = vpack.c.bf16 %v1683_v4, %v1683_v4  ;;  %v517_v12 = vpack.c.bf16 %v1682_v5, %v1682_v5  ;;  %v1726_v5 = vpop.permute.xlu1 %1725  ;;  %v624_v7 = vsel %vm598_vm1, %v595_v63, 0  ;;  %v774_v47 = vlaneseq }
 0x15d   : > { %v1728_v13 = vunpack.i.h.bf16 %v1726_v5  ;;  %v1727_v14 = vunpack.i.l.bf16 %v1726_v5  ;;  %v594_v22 = vpack.c.b16 %v583_v8, %v582_v9  ;;  %v794_v62 = vrot.slane %v782_v58, 4 }
 0x15e   : > { %v589_v19 = vunpack.c.l.b16 %v518_v11  ;;  %v588_v20 = vunpack.c.l.b16 %v517_v12  ;;  %v690_v12 = vunpack.c.l.b16 %v525_v2  ;;  %v2049_v56 = vshrl.u32 %v774_v47, 7 }
 0x15f   : > { %v523_v27 = vpack.c.bf16 %v1727_v14, %v1727_v14  ;;  %v796_v63 = vrot.slane %v782_v58, 6  ;;  %v797_v0 = vrot.slane %v782_v58, 7  ;;  %v795_v8 = vrot.slane %v782_v58, 5 }
 0x160   : > { %v597_v23 = vpack.c.b16 %v589_v19, %v588_v20  ;;  %v1731_v19 = vpop.permute.xlu2 %1730  ;;  %v703_v28 = vpack.c.b16 %v691_v6, %v690_v12  ;;  %v792_v6 = vrot.slane %v782_v58, 2  ;;  %v2060_v9 = vadd.s32 24, %v2049_v56 }
 0x161   : > { %v1706_v29 = vpop.permute.xlu0 %1705  ;;  %v1732_v30 = vunpack.i.l.bf16 %v1731_v19  ;;  %v791_v12 = vrot.slane %v782_v58, 1 }
 0x162   : > { %v630_v33 = vsel %vm598_vm1, %v597_v23, 0  ;;  %v1708_v38 = vunpack.i.h.bf16 %v1706_v29  ;;  %v1707_v39 = vunpack.i.l.bf16 %v1706_v29  ;;  %v524_v23 = vpack.c.bf16 %v1728_v13, %v1728_v13  ;;  %v2066_v13 = vld [vmem:[%s1976_s20 + $0x18] ss:$0 sm:$0xff] }
 0x163   : > { %632 = vmatpush.bf16.xpose.msra.mxu1 %v630_v33  ;;  %1609 = vmatpush.bf16.xpose.msra.mxu3 %v630_v33  ;;  %v1733_v29 = vunpack.i.h.bf16 %v1731_v19  ;;  %v621_v33 = vsel %vm598_vm1, %v594_v22, 0  ;;  %v507_v41 = vpack.c.bf16 %v1732_v30, %v1732_v30  ;;  %v2072_v19 = vperm.slane %v796_v63, 0 }
 0x164   : > { %742 = vmatpush.bf16.xpose.msrb.mxu0 %v736_v40  ;;  %1618 = vmatpush.bf16.xpose.msra.mxu2 %v736_v40  ;;  %v528_v49 = vpack.c.bf16 %v1708_v38, %v1708_v38  ;;  %v527_v50 = vpack.c.bf16 %v1707_v39, %v1707_v39  ;;  %v689_v37 = vunpack.c.l.b16 %v524_v23  ;;  %v688_v38 = vunpack.c.l.b16 %v523_v27 }
 0x165   : > { %v727_v39 = vsel %vm598_vm1, %v703_v28, 0  ;;  %v508_v40 = vpack.c.bf16 %v1733_v29, %v1733_v29  ;;  %v578_v48 = vunpack.c.l.b16 %v507_v41  ;;  %v2087_v29 = vld [vmem:[%s1976_s20 + $0x8] ss:$0 sm:$0xff]  ;;  %v2089_v30 = vperm.slane %v792_v6, 0 }
 0x166   : > { %v693_v59 = vunpack.c.l.b16 %v528_v49  ;;  %v692_v60 = vunpack.c.l.b16 %v527_v50  ;;  %v702_v43 = vpack.c.b16 %v689_v37, %v688_v38  ;;  %vm901_vm2 = vcmp.eq.s32.totalorder %v2066_v13, %v2049_v56 }
 0x167   : > { %v579_v44 = vunpack.c.l.b16 %v508_v40  ;;  %v2101_v37 = vperm.slane %v791_v12, 0  ;;  %vm891_vm6 = vcmp.eq.s32.totalorder %v2072_v19, %v2049_v56  ;;  %vm871_vm15 = vcmp.eq.s32.totalorder %v2089_v30, %v2049_v56 }
 0x168   : > { %v704_v4 = vpack.c.b16 %v693_v59, %v692_v60  ;;  %v724_v50 = vsel %vm598_vm1, %v702_v43, 0  ;;  %v2054_v59 = vadd.s32 8, %v2049_v56  ;;  %v2057_v60 = vadd.s32 16, %v2049_v56 }
 0x169   : > { %v1721_v3 = vpop.permute.xlu0 %1720  ;;  %v592_v51 = vpack.c.b16 %v579_v44, %v578_v48  ;;  %vm866_vm14 = vcmp.eq.s32.totalorder %v2101_v37, %v2049_v56 }
 0x16a   : > { %v1723_v10 = vunpack.i.h.bf16 %v1721_v3  ;;  %v1722_v11 = vunpack.i.l.bf16 %v1721_v3  ;;  %v730_v18 = vsel %vm598_vm1, %v704_v4, 0  ;;  %vm893_vm8 = vcmp.eq.s32.totalorder %v2072_v19, %v2057_v60 }
 0x16b   : > { %633 = vmatpush.bf16.xpose.msra.mxu1 %v627_v57  ;;  %1610 = vmatpush.bf16.xpose.msra.mxu3 %v627_v57  ;;  %v615_v52 = vsel %vm598_vm1, %v592_v51, 0  ;;  %v780_v57 = vld [vmem:[%s1976_s20] sm:$0xff]  ;;  %vm858_vm11 = vcmp.eq.s32.totalorder %v2087_v29, %v2057_v60  ;;  %s1519_s20 = sshll.u32 %s2884_s14, 1 }
 0x16c   : > { %743 = vmatpush.bf16.xpose.msrb.mxu0 %v733_v61  ;;  %1619 = vmatpush.bf16.xpose.msra.mxu2 %v733_v61  ;;  %v510_v20 = vpack.c.bf16 %v1723_v10, %v1723_v10  ;;  %v509_v21 = vpack.c.bf16 %v1722_v11, %v1722_v11  ;;  %v785_v61 = vrot.slane %v780_v57, 2  ;;  %v786_v1 = vrot.slane %v780_v57, 3  ;;  %s294_s9 = scalar_lea.vmem [#allocation4], %s1519_s20 }
 0x16d   : > { %v787_v2 = vrot.slane %v780_v57, 4  ;;  %v788_v3 = vrot.slane %v780_v57, 5  ;;  %v789_v4 = vrot.slane %v780_v57, 6  ;;  %v790_v5 = vrot.slane %v780_v57, 7  ;;  %s1396_s10 = sshll.u32 %s294_s9, 4  ;;  %s2925_s10 = int_to_ptr.vmem [resolvable:$true] %s1396_s10 }
 0x16e   : > { %v581_v31 = vunpack.c.l.b16 %v510_v20  ;;  %v580_v32 = vunpack.c.l.b16 %v509_v21  ;;  %v2063_v10 = vadd.s32 32, %v2049_v56  ;;  %v784_v11 = vrot.slane %v780_v57, 1 }
 0x16f   : > { %v2068_v14 = vperm.slane %v785_v61, 0  ;;  %v2074_v20 = vperm.slane %v797_v0, 0  ;;  %v2076_v21 = vperm.slane %v786_v1, 0  ;;  %v2078_v22 = vperm.slane %v787_v2, 0 }
 0x170   : > { %v593_v42 = vpack.c.b16 %v581_v31, %v580_v32  ;;  %v2080_v23 = vperm.slane %v788_v3, 0  ;;  %v2082_v27 = vperm.slane %v789_v4, 0  ;;  %v2084_v28 = vperm.slane %v790_v5, 0 }
 0x171   : > { %v2093_v32 = vperm.slane %v795_v8, 0  ;;  %vm896_vm7 = vcmp.eq.s32.totalorder %v2074_v20, %v2049_v56  ;;  %v2133_v40 = vperm.slane %v780_v57, 0  ;;  %v2135_v41 = vperm.slane %v784_v11, 0 }
 0x172   : > { %v618_v49 = vsel %vm598_vm1, %v593_v42, 0  ;;  %vm852_vm4 = vcmp.eq.s32.totalorder %v2084_v28, %v2054_v59  ;;  %vm841_vm10 = vcmp.eq.s32.totalorder %v2080_v23, %v2049_v56 }
 0x173   : > { %634 = vmatpush.bf16.xpose.msra.mxu1 %v624_v7  ;;  %1611 = vmatpush.bf16.xpose.msra.mxu3 %v624_v7  ;;  %v793_v7 = vrot.slane %v782_v58, 3  ;;  %vm816_vm9 = vcmp.eq.s32.totalorder %v2133_v40, %v2049_v56  ;;  %vm818_vm3 = vcmp.eq.s32.totalorder %v2133_v40, %v2057_v60 }
 0x174   : > { %744 = vmatpush.bf16.xpose.msrb.mxu0 %v730_v18  ;;  %1620 = vmatpush.bf16.xpose.msra.mxu2 %v730_v18  ;;  %v2070_v18 = vperm.slane %v794_v62, 0 }
 0x175   : > { %v2091_v31 = vperm.slane %v793_v7, 0 }
 0x176   : > { %vm881_vm5 = vcmp.eq.s32.totalorder %v2070_v18, %v2049_v56  ;;  %vm883_vm12 = vcmp.eq.s32.totalorder %v2070_v18, %v2057_v60 }
 0x177   : > { %vm876_vm0 = vcmp.eq.s32.totalorder %v2091_v31, %v2049_v56 }
 0x17b   : > { %635 = vmatpush.bf16.xpose.msra.mxu1 %v621_v33  ;;  %1612 = vmatpush.bf16.xpose.msra.mxu3 %v621_v33  ;;  %v2099_v33 = vperm.slane %v782_v58, 0 }
 0x17c   : > { %745 = vmatpush.bf16.xpose.msrb.mxu0 %v727_v39  ;;  %1621 = vmatpush.bf16.xpose.msra.mxu2 %v727_v39 }
 0x17d   : > { %vm861_vm13 = vcmp.eq.s32.totalorder %v2099_v33, %v2049_v56 }
 0x183   : > { %636 = vmatpush.bf16.xpose.msra.mxu1 %v618_v49  ;;  %1613 = vmatpush.bf16.xpose.msra.mxu3 %v618_v49 }
 0x184   : > { %746 = vmatpush.bf16.xpose.msrb.mxu0 %v724_v50  ;;  %1622 = vmatpush.bf16.xpose.msra.mxu2 %v724_v50 }
 0x18b   : > { %637 = vmatpush.bf16.xpose.msra.mxu1 %v615_v52  ;;  %1614 = vmatpush.bf16.xpose.msra.mxu3 %v615_v52 }
 0x18c   : > { %747 = vmatpush.bf16.xpose.msrb.mxu0 %v721_v53  ;;  %1623 = vmatpush.bf16.xpose.msra.mxu2 %v721_v53 }
 0x193   : > { %638 = vmatpush.bf16.xpose.msra.mxu1 %v612_v54  ;;  %1615 = vmatpush.bf16.xpose.msra.mxu3 %v612_v54 }
 0x194   : > { %748 = vmatpush.bf16.xpose.msrb.mxu0 %v718_v55  ;;  %1624 = vmatpush.bf16.xpose.msra.mxu2 %v718_v55 }
 0x19b   : > { %1585 = vmatmul.msk.bf16.vlgmr.msra.gmra.mxu2 %vm598_vm1, %v1608_v45  ;;  %639 = vmatpush.bf16.xpose.msra.mxu1 %v609_v24 }
 0x19c   : > { %1616 = vmatpush.bf16.xpose.msra.mxu3 %v609_v24  ;;  %1584 = vmatmul.msk.bf16.vlgmr.msrb.gmra.mxu0 %vm598_vm1, %v1607_v46 }
 0x1a2   : > { %1573 = vmatmul.msk.bf16.vlgmr.msra.gmra.mxu1 %vm598_vm1, %v1605_v25 }
 0x1a3   : > { %1574 = vmatmul.msk.bf16.vlgmr.msra.gmra.mxu3 %vm598_vm1, %v1606_v26 }
 0x1ab   : > { %1586 = vmatmul.msk.bf16.gmra.mxu2 %vm598_vm1, %v667_v36 }
 0x1b3   : > { %1575 = vmatmul.msk.bf16.gmra.mxu3 %vm598_vm1, %v557_v17  ;;  %vm837_vm1 = vcmp.eq.s32.totalorder %v2078_v22, %v2054_v59 }
 0x219   : > { %v750_v38 = vpop.f32.mrf.mxu0 }
 0x21a   : > { %v769_v39 = vmul.f32 0.17677669, %v750_v38 }
 0x21c   : > { %v2168_v43 = vsel %vm881_vm5, %v769_v39, 0.0  ;;  %vm886_vm5 = vcmp.eq.s32.totalorder %v2093_v32, %v2049_v56  ;;  %v981_v49 = vsel %vm891_vm6, %v769_v39, 0.0  ;;  %v986_v50 = vsel %vm896_vm7, %v769_v39, 0.0 }
 0x21d   : > { %3008 = vst [vmem:[#allocation8_spill] sm:$0xff] %v2168_v43  ;;  %v2199_v51 = vsel %vm901_vm2, %v769_v39, 0.0  ;;  %vm842_vm6 = vcmp.eq.s32.totalorder %v2080_v23, %v2054_v59  ;;  %v2210_v54 = vsel %vm861_vm13, %v769_v39, 0.0  ;;  %v2215_v55 = vsel %vm866_vm14, %v769_v39, 0.0 }
 0x21e   : > { %v755_v42 = vpop.f32.mrf.mxu2  ;;  %3009 = vst [vmem:[#allocation9_spill] sm:$0xff] %v2215_v55  ;;  %v2220_v45 = vsel %vm871_vm15, %v769_v39, 0.0  ;;  %v2225_v46 = vsel %vm876_vm0, %v769_v39, 0.0  ;;  %vm3013_vm2 = vcmp.eq.s32.totalorder %v2066_v13, %v2057_v60  ;;  %vm817_vm7 = vcmp.eq.s32.totalorder %v2133_v40, %v2054_v59 }
 0x21f   : > { %v2170_v44 = vmul.f32 0.17677669, %v755_v42  ;;  %v641_v48 = vpop.f32.mrf.mxu1  ;;  %3010 = vst [vmem:[#allocation10_spill] sm:$0xff] %v2220_v45  ;;  %vm822_vm13 = vcmp.eq.s32.totalorder %v2135_v41, %v2054_v59  ;;  %v2254_v34 = vsel %vm886_vm5, %v769_v39, 0.0  ;;  %vm3018_vm15 = vcmp.eq.s32.totalorder %v2078_v22, %v2049_v56 }
 0x220   : > { %v764_v52 = vmul.f32 0.17677669, %v641_v48  ;;  %3011 = vst [vmem:[#allocation11_spill] sm:$0xff] %v2225_v46  ;;  %vm3019_vm0 = vcmp.eq.s32.totalorder %v2082_v27, %v2049_v56  ;;  %vm3026_vm14 = vcmp.eq.s32.totalorder %v2074_v20, %v2054_v59  ;;  %vm3042_vm5 = vcmp.eq.s32.totalorder %v2101_v37, %v2054_v59 }
 0x221   : > { %v752_v53 = vpop.f32.mrf.mxu0  ;;  %v2231_v24 = vsel %vm893_vm8, %v2170_v44, 0.0  ;;  %v2237_v25 = vsel %vm3013_vm2, %v2170_v44, 0.0  ;;  %vm3015_vm8 = vcmp.eq.s32.totalorder %v2099_v33, %v2057_v60  ;;  %3017 = vst [vmem:[#allocation15_spill] sm:$0xff] %v2254_v34  ;;  %vm827_vm2 = vcmp.eq.s32.totalorder %v2068_v14, %v2054_v59 }
 0x222   : > { %3012 = vst [vmem:[#allocation12_spill] sm:$0xff] %v2231_v24  ;;  %v2249_v26 = vsel %vm3015_vm8, %v2170_v44, 0.0  ;;  %v2259_v35 = vsel %vm3018_vm15, %v764_v52, 0.0  ;;  %v2264_v36 = vsel %vm3019_vm0, %v764_v52, 0.0  ;;  %v770_v15 = vmul.f32 0.17677669, %v752_v53 }
 0x223   : > { %3014 = vst [vmem:[#allocation13_spill] sm:$0xff] %v2237_v25  ;;  %vm3020_vm15 = vcmp.eq.s32.totalorder %v2101_v37, %v2057_v60  ;;  %vm3022_vm0 = vcmp.eq.s32.totalorder %v2084_v28, %v2049_v56  ;;  %vm3023_vm8 = vcmp.eq.s32.totalorder %v2087_v29, %v2049_v56  ;;  %v2299_v57 = vsel %vm816_vm9, %v764_v52, 0.0 }
 0x224   : > { %3016 = vst [vmem:[#allocation14_spill] sm:$0xff] %v2249_v26  ;;  %v2278_v16 = vsel %vm3020_vm15, %v2170_v44, 0.0  ;;  %v2283_v17 = vsel %vm3022_vm0, %v764_v52, 0.0  ;;  %v2288_v47 = vsel %vm3023_vm8, %v764_v52, 0.0  ;;  %vm3024_vm0 = vcmp.eq.s32.totalorder %v2135_v41, %v2049_v56 }
 0x225   : > { %3021 = vst [vmem:[#allocation16_spill] sm:$0xff] %v2278_v16  ;;  %v2304_v58 = vsel %vm3024_vm0, %v764_v52, 0.0  ;;  %vm3025_vm8 = vcmp.eq.s32.totalorder %v2072_v19, %v2054_v59  ;;  %v987_v62 = vsel %vm3026_vm14, %v770_v15, 0.0  ;;  %vm3027_vm0 = vcmp.eq.s32.totalorder %v2068_v14, %v2049_v56 }
 0x226   : > { %v982_v61 = vsel %vm3025_vm8, %v770_v15, 0.0  ;;  %v2321_v63 = vsel %vm3027_vm0, %v764_v52, 0.0  ;;  %vm3028_vm8 = vcmp.eq.s32.totalorder %v2076_v21, %v2049_v56  ;;  %vm3029_vm14 = vcmp.eq.s32.totalorder %v2066_v13, %v2054_v59  ;;  %v646_v2 = vpop.f32.mrf.mxu3  ;;  %v757_v3 = vpop.f32.mrf.mxu2 }
 0x227   : > { %v2326_v0 = vsel %vm3028_vm8, %v764_v52, 0.0  ;;  %v992_v1 = vsel %vm3029_vm14, %v770_v15, 0.0  ;;  %vm879_vm9 = vcmp.eq.s32.totalorder %v2091_v31, %v2060_v9  ;;  %v2342_v4 = vsel %vm841_vm10, %v764_v52, 0.0  ;;  %v643_v12 = vpop.f32.mrf.mxu1 }
 0x228   : > { %vm3030_vm8 = vcmp.eq.s32.totalorder %v2089_v30, %v2057_v60  ;;  %vm3032_vm14 = vcmp.eq.s32.totalorder %v2091_v31, %v2057_v60  ;;  %vm3034_vm0 = vcmp.eq.s32.totalorder %v2070_v18, %v2054_v59  ;;  %vm3036_vm10 = vcmp.eq.s32.totalorder %v2093_v32, %v2054_v59 }
 0x229   : > { %v2348_v5 = vsel %vm3030_vm8, %v2170_v44, 0.0  ;;  %v2354_v6 = vsel %vm3032_vm14, %v2170_v44, 0.0  ;;  %v2361_v56 = vsel %vm3034_vm0, %v770_v15, 0.0  ;;  %v2366_v7 = vsel %vm3036_vm10, %v770_v15, 0.0 }
 0x22a   : > { %3031 = vst [vmem:[#allocation17_spill] sm:$0xff] %v2348_v5  ;;  %v766_v8 = vmul.f32 0.17677669, %v646_v2  ;;  %v2368_v11 = vmul.f32 0.17677669, %v757_v3  ;;  %v2376_v38 = vadd.f32 %v982_v61, %v981_v49  ;;  %v2378_v39 = vadd.f32 %v987_v62, %v986_v50 }
 0x22b   : > { %3033 = vst [vmem:[#allocation18_spill] sm:$0xff] %v2354_v6  ;;  %v765_v42 = vmul.f32 0.17677669, %v643_v12  ;;  %vm3040_vm15 = vcmp.eq.s32.totalorder %v2099_v33, %v2054_v59  ;;  %v2394_v49 = vadd.f32 %v992_v1, %v2199_v51  ;;  %vm854_vm10 = vcmp.eq.s32.totalorder %v2084_v28, %v2060_v9 }
 0x22c   : > { %3035 = vst [vmem:[#allocation19_spill] sm:$0xff] %v2361_v56  ;;  %v2391_v48 = vsel %vm3040_vm15, %v770_v15, 0.0  ;;  %v2407_v50 = vsel %vm3042_vm5, %v770_v15, 0.0  ;;  %vm3044_vm15 = vcmp.eq.s32.totalorder %v2089_v30, %v2054_v59  ;;  %vm3046_vm0 = vcmp.eq.s32.totalorder %v2091_v31, %v2054_v59 }
 0x22d   : > { %3037 = vst [vmem:[#allocation20_spill] sm:$0xff] %v2366_v7  ;;  %v2412_v51 = vsel %vm3044_vm15, %v770_v15, 0.0  ;;  %v2417_v52 = vsel %vm3046_vm0, %v770_v15, 0.0  ;;  %vm3048_vm8 = vcmp.eq.s32.totalorder %v2082_v27, %v2057_v60  ;;  %vm3049_vm14 = vcmp.eq.s32.totalorder %v2082_v27, %v2054_v59 }
 0x22e   : > { %3038 = vst [vmem:[#allocation21_spill] sm:$0xff] %v2376_v38  ;;  %v2422_v53 = vsel %vm3048_vm8, %v766_v8, 0.0  ;;  %v937_v61 = vsel %vm3049_vm14, %v765_v42, 0.0  ;;  %v942_v62 = vsel %vm852_vm4, %v765_v42, 0.0  ;;  %vm875_vm5 = vcmp.eq.s32.totalorder %v2089_v30, %v2063_v10 }
 0x22f   : > { %3039 = vst [vmem:[#allocation22_spill] sm:$0xff] %v2378_v39  ;;  %vm880_vm0 = vcmp.eq.s32.totalorder %v2091_v31, %v2063_v10  ;;  %vm885_vm15 = vcmp.eq.s32.totalorder %v2070_v18, %v2063_v10  ;;  %vm890_vm8 = vcmp.eq.s32.totalorder %v2093_v32, %v2063_v10  ;;  %v2442_v15 = vsel %vm883_vm12, %v2170_v44, 0.0 }
 0x230   : > { %3041 = vst [vmem:[#allocation23_spill] sm:$0xff] %v2394_v49  ;;  %v2447_v1 = vsel %vm858_vm11, %v766_v8, 0.0  ;;  %vm3051_vm4 = vcmp.eq.s32.totalorder %v2066_v13, %v2060_v9  ;;  %vm3053_vm14 = vcmp.eq.s32.totalorder %v2087_v29, %v2054_v59  ;;  %v2461_v12 = vsel %vm818_vm3, %v766_v8, 0.0 }
 0x231   : > { %3043 = vst [vmem:[#allocation24_spill] sm:$0xff] %v2407_v50  ;;  %v2453_v2 = vsel %vm3051_vm4, %v2368_v11, 0.0  ;;  %v947_v3 = vsel %vm3053_vm14, %v765_v42, 0.0  ;;  %v927_v49 = vsel %vm837_vm1, %v765_v42, 0.0  ;;  %v2469_v25 = vsel %vm842_vm6, %v765_v42, 0.0 }
 0x232   : > { %3045 = vst [vmem:[#allocation25_spill] sm:$0xff] %v2412_v51  ;;  %v2475_v39 = vadd.f32 %v942_v62, %v2283_v17  ;;  %vm895_vm11 = vcmp.eq.s32.totalorder %v2072_v19, %v2063_v10  ;;  %vm898_vm3 = vcmp.eq.s32.totalorder %v2074_v20, %v2057_v60  ;;  %v2482_v38 = vadd.f32 %v947_v3, %v2288_v47  ;;  %v760_v62 = vpop.f32.mrf.mxu2 }
 0x233   : > { %3047 = vst [vmem:[#allocation26_spill] sm:$0xff] %v2417_v52  ;;  %v907_v24 = vsel %vm817_vm7, %v765_v42, 0.0  ;;  %vm3054_vm12 = vcmp.eq.s32.totalorder %v2135_v41, %v2057_v60  ;;  %vm820_vm1 = vcmp.eq.s32.totalorder %v2133_v40, %v2063_v10  ;;  %vm825_vm6 = vcmp.eq.s32.totalorder %v2135_v41, %v2063_v10 }
 0x234   : > { %3050 = vst [vmem:[#allocation27_spill] sm:$0xff] %v2442_v15  ;;  %v913_v17 = vsel %vm3054_vm12, %v766_v8, 0.0  ;;  %v917_v47 = vsel %vm827_vm2, %v765_v42, 0.0  ;;  %vm3055_vm7 = vcmp.eq.s32.totalorder %v2068_v14, %v2057_v60  ;;  %vm3057_vm14 = vcmp.eq.s32.totalorder %v2076_v21, %v2057_v60 }
 0x235   : > { %3052 = vst [vmem:[#allocation28_spill] sm:$0xff] %v2453_v2  ;;  %v2472_v2 = vadd.f32 %v937_v61, %v2264_v36  ;;  %v912_v36 = vsel %vm822_vm13, %v765_v42, 0.0  ;;  %v648_v61 = vpop.f32.mrf.mxu3  ;;  %v918_v3 = vsel %vm3055_vm7, %v766_v8, 0.0  ;;  %vm3056_vm13 = vcmp.eq.s32.totalorder %v2076_v21, %v2054_v59 }
 0x236   : > { %v922_v7 = vsel %vm3056_vm13, %v765_v42, 0.0  ;;  %v923_v34 = vsel %vm3057_vm14, %v766_v8, 0.0  ;;  %v767_v15 = vmul.f32 0.17677669, %v648_v61  ;;  %vm835_vm12 = vcmp.eq.s32.totalorder %v2076_v21, %v2063_v10 }
 0x237   : > { %vm3058_vm7 = vcmp.eq.s32.totalorder %v2078_v22, %v2057_v60  ;;  %vm3059_vm13 = vcmp.eq.s32.totalorder %v2080_v23, %v2057_v60  ;;  %vm3060_vm14 = vcmp.eq.s32.totalorder %v2084_v28, %v2057_v60  ;;  %v2532_v61 = vmul.f32 0.17677669, %v760_v62 }
 0x238   : > { %v2520_v56 = vsel %vm3058_vm7, %v766_v8, 0.0  ;;  %v2525_v59 = vsel %vm3059_vm13, %v766_v8, 0.0  ;;  %v2530_v42 = vsel %vm3060_vm14, %v766_v8, 0.0  ;;  %vm3061_vm7 = vcmp.eq.s32.totalorder %v2099_v33, %v2060_v9 }
 0x239   : > { %v2540_v43 = vsel %vm3061_vm7, %v2368_v11, 0.0  ;;  %vm3063_vm13 = vcmp.eq.s32.totalorder %v2101_v37, %v2060_v9  ;;  %vm3065_vm14 = vcmp.eq.s32.totalorder %v2089_v30, %v2060_v9  ;;  %v2558_v62 = vsel %vm879_vm9, %v2368_v11, 0.0 }
 0x23a   : > { %3062 = vst [vmem:[#allocation29_spill] sm:$0xff] %v2540_v43  ;;  %v2546_v6 = vsel %vm3063_vm13, %v2368_v11, 0.0  ;;  %v2552_v8 = vsel %vm3065_vm14, %v2368_v11, 0.0  ;;  %vm3068_vm7 = vcmp.eq.s32.totalorder %v2070_v18, %v2060_v9  ;;  %vm3070_vm13 = vcmp.eq.s32.totalorder %v2093_v32, %v2057_v60 }
 0x23b   : > { %3064 = vst [vmem:[#allocation30_spill] sm:$0xff] %v2546_v6  ;;  %v2564_v5 = vsel %vm3068_vm7, %v2368_v11, 0.0  ;;  %v2570_v6 = vsel %vm3070_vm13, %v2170_v44, 0.0  ;;  %vm3072_vm14 = vcmp.eq.s32.totalorder %v2093_v32, %v2060_v9  ;;  %vm3074_vm9 = vcmp.eq.s32.totalorder %v2087_v29, %v2060_v9 }
 0x23c   : > { %3066 = vst [vmem:[#allocation31_spill] sm:$0xff] %v2552_v8  ;;  %v2576_v8 = vsel %vm3072_vm14, %v2368_v11, 0.0  ;;  %vm3075_vm7 = vcmp.eq.s32.totalorder %v2133_v40, %v2060_v9  ;;  %vm3076_vm2 = vcmp.eq.s32.totalorder %v2135_v41, %v2060_v9  ;;  %vm3077_vm13 = vcmp.eq.s32.totalorder %v2072_v19, %v2060_v9 }
 0x23d   : > { %3067 = vst [vmem:[#allocation32_spill] sm:$0xff] %v2558_v62  ;;  %v2581_v62 = vsel %vm3074_vm9, %v767_v15, 0.0  ;;  %v914_v52 = vsel %vm3076_vm2, %v767_v15, 0.0  ;;  %vm999_vm14 = vcmask 1043456   ;;  %vm3079_vm4 = vcmp.eq.s32.totalorder %v2068_v14, %v2060_v9  ;;  %v651_v30 = vpop.f32.mrf.mxu3 }
 0x23e   : > { %3069 = vst [vmem:[#allocation33_spill] sm:$0xff] %v2564_v5  ;;  %v909_v5 = vsel %vm3075_vm7, %v767_v15, 0.0  ;;  %vm3080_vm9 = vcmp.eq.s32.totalorder %v2076_v21, %v2060_v9  ;;  %vm3081_vm7 = vcmp.eq.s32.totalorder %v2078_v22, %v2060_v9  ;;  %vm3082_vm2 = vcmp.eq.s32.totalorder %v2080_v23, %v2060_v9 }
 0x23f   : > { %3071 = vst [vmem:[#allocation34_spill] sm:$0xff] %v2570_v6  ;;  %v2593_v6 = vsel %vm3077_vm13, %v2368_v11, 0.0  ;;  %v924_v46 = vsel %vm3080_vm9, %v767_v15, 0.0  ;;  %v929_v43 = vsel %vm3081_vm7, %v767_v15, 0.0  ;;  %v934_v51 = vsel %vm3082_vm2, %v767_v15, 0.0 }
 0x240   : > { %3073 = vst [vmem:[#allocation35_spill] sm:$0xff] %v2576_v8  ;;  %v919_v8 = vsel %vm3079_vm4, %v767_v15, 0.0  ;;  %vm3083_vm13 = vcmp.eq.s32.totalorder %v2082_v27, %v2060_v9  ;;  %v2613_v45 = vsel %vm854_vm10, %v767_v15, 0.0  ;;  %vm3084_vm4 = vcmp.eq.s32.totalorder %v2099_v33, %v2063_v10 }
 0x241   : > { %3078 = vst [vmem:[#allocation36_spill] sm:$0xff] %v2593_v6  ;;  %v939_v6 = vsel %vm3083_vm13, %v767_v15, 0.0  ;;  %v2619_v16 = vsel %vm3084_vm4, %v2532_v61, 0.0  ;;  %vm3086_vm9 = vcmp.eq.s32.totalorder %v2101_v37, %v2063_v10  ;;  %v2631_v50 = vsel %vm875_vm5, %v2532_v61, 0.0 }
 0x242   : > { %3085 = vst [vmem:[#allocation37_spill] sm:$0xff] %v2619_v16  ;;  %v2625_v26 = vsel %vm3086_vm9, %v2532_v61, 0.0  ;;  %v2637_v15 = vsel %vm880_vm0, %v2532_v61, 0.0  ;;  %v2643_v33 = vsel %vm885_vm15, %v2532_v61, 0.0  ;;  %v2649_v37 = vsel %vm890_vm8, %v2532_v61, 0.0 }
 0x243   : > { %3087 = vst [vmem:[#allocation38_spill] sm:$0xff] %v2625_v26  ;;  %v996_v26 = vadd.f32 %v907_v24, %v2299_v57  ;;  %v1008_v31 = vadd.f32 %v912_v36, %v2304_v58  ;;  %v1030_v16 = vadd.f32 %v922_v7, %v2326_v0  ;;  %v2655_v55 = vmul.f32 0.17677669, %v651_v30 }
 0x244   : > { %3088 = vst [vmem:[#allocation39_spill] sm:$0xff] %v2631_v50  ;;  %v762_v50 = vpop.f32.mrf.mxu2  ;;  %v2661_v18 = vsel %vm895_vm11, %v2532_v61, 0.0  ;;  %v2667_v32 = vsel %vm898_vm3, %v2170_v44, 0.0  ;;  %v1041_v24 = vadd.f32 %v927_v49, %v2259_v35  ;;  %vm855_vm10 = vcmp.eq.s32.totalorder %v2084_v28, %v2063_v10 }
 0x245   : > { %3089 = vst [vmem:[#allocation40_spill] sm:$0xff] %v2637_v15  ;;  %v1019_v15 = vadd.f32 %v917_v47, %v2321_v63  ;;  %v997_v57 = vadd.f32 %v996_v26, %v2461_v12  ;;  %v1009_v58 = vadd.f32 %v1008_v31, %v913_v17  ;;  %v1052_v63 = vadd.f32 %v2469_v25, %v2342_v4 }
 0x246   : > { %v1064_v19 = vadd.f32 %v2472_v2, %v2422_v53  ;;  %v910_v60 = vsel %vm820_vm1, %v2655_v55, 0.0  ;;  %v915_v44 = vsel %vm825_vm6, %v2655_v55, 0.0  ;;  %vm3090_vm5 = vcmp.eq.s32.totalorder %v2068_v14, %v2063_v10 }
 0x247   : > { %v920_v26 = vsel %vm3090_vm5, %v2655_v55, 0.0  ;;  %v1020_v35 = vadd.f32 %v1019_v15, %v918_v3  ;;  %v925_v25 = vsel %vm835_vm12, %v2655_v55, 0.0  ;;  %vm3091_vm0 = vcmp.eq.s32.totalorder %v2078_v22, %v2063_v10 }
 0x248   : > { %v930_v40 = vsel %vm3091_vm0, %v2655_v55, 0.0  ;;  %vm3092_vm15 = vcmp.eq.s32.totalorder %v2080_v23, %v2063_v10  ;;  %v1031_v0 = vadd.f32 %v1030_v16, %v923_v34  ;;  %vm3093_vm8 = vcmp.eq.s32.totalorder %v2082_v27, %v2063_v10 }
 0x249   : > { %v935_v41 = vsel %vm3092_vm15, %v2655_v55, 0.0  ;;  %v940_v14 = vsel %vm3093_vm8, %v2655_v55, 0.0  ;;  %v998_v4 = vadd.f32 %v997_v57, %v909_v5  ;;  %v1000_v21 = vsel %vm999_vm14, %v910_v60, 0.0  ;;  %v653_v5 = vpop.f32.mrf.mxu3 }
 0x24a   : > { %v1010_v7 = vadd.f32 %v1009_v58, %v914_v52  ;;  %v1011_v49 = vsel %vm999_vm14, %v915_v44, 0.0  ;;  %v1021_v50 = vadd.f32 %v1020_v35, %v919_v8  ;;  %v1022_v22 = vsel %vm999_vm14, %v920_v26, 0.0 }
 0x24b   : > { %v1032_v53 = vadd.f32 %v1031_v0, %v924_v46  ;;  %vm899_vm11 = vcmp.eq.s32.totalorder %v2074_v20, %v2060_v9  ;;  %v1001_v23 = vadd.f32 %v1000_v21, %v998_v4  ;;  %v1033_v16 = vsel %vm999_vm14, %v925_v25, 0.0 }
 0x24c   : > { %v1012_v34 = vadd.f32 %v1011_v49, %v1010_v7  ;;  %v1042_v27 = vadd.f32 %v1041_v24, %v2520_v56  ;;  %vm860_vm3 = vcmp.eq.s32.totalorder %v2087_v29, %v2063_v10  ;;  %v1023_v52 = vadd.f32 %v1022_v22, %v1021_v50 }
 0x24d   : > { %v1034_v2 = vadd.f32 %v1033_v16, %v1032_v53  ;;  %v1044_v12 = vsel %vm999_vm14, %v930_v40, 0.0  ;;  %v1053_v36 = vadd.f32 %v1052_v63, %v2525_v59  ;;  %vm900_vm1 = vcmp.eq.s32.totalorder %v2074_v20, %v2063_v10 }
 0x24e   : > { %v1002_v46 = vrot.slane %v1001_v23, 4  ;;  %v1013_v17 = vrot.slane %v1012_v34, 4  ;;  %v1043_v47 = vadd.f32 %v1042_v27, %v929_v43  ;;  %v1055_v3 = vsel %vm999_vm14, %v935_v41, 0.0 }
 0x24f   : > { %vm905_vm6 = vcmp.eq.s32.totalorder %v2066_v13, %v2063_v10  ;;  %v1024_v56 = vrot.slane %v1023_v52, 4  ;;  %v1035_v8 = vrot.slane %v1034_v2, 4  ;;  %v1054_v15 = vadd.f32 %v1053_v36, %v934_v51  ;;  %v3094_v13 = vld [vmem:[#allocation9_spill] sm:$0xff] }
 0x250   : > { %v1065_v30 = vadd.f32 %v1064_v19, %v939_v6  ;;  %v1003_v31 = vadd.f32 %v1002_v46, %v1001_v23  ;;  %v1014_v24 = vadd.f32 %v1013_v17, %v1012_v34  ;;  %v1045_v57 = vadd.f32 %v1044_v12, %v1043_v47 }
 0x251   : > { %v1066_v59 = vsel %vm999_vm14, %v940_v14, 0.0  ;;  %v1025_v58 = vadd.f32 %v1024_v56, %v1023_v52  ;;  %v1036_v63 = vadd.f32 %v1035_v8, %v1034_v2  ;;  %v1056_v60 = vadd.f32 %v1055_v3, %v1054_v15 }
 0x252   : > { %v1067_v44 = vadd.f32 %v1066_v59, %v1065_v30  ;;  %v945_v43 = vsel %vm855_vm10, %v2655_v55, 0.0  ;;  %v1004_v26 = vrot.slane %v1003_v31, 2  ;;  %v1015_v35 = vrot.slane %v1014_v24, 2  ;;  %v3097_v59 = vld [vmem:[#allocation37_spill] sm:$0xff] }
 0x253   : > { %v1046_v25 = vrot.slane %v1045_v57, 4  ;;  %v1026_v40 = vrot.slane %v1025_v58, 2  ;;  %v1037_v51 = vrot.slane %v1036_v63, 2  ;;  %v1057_v6 = vrot.slane %v1056_v60, 4 }
 0x254   : > { %v1068_v19 = vrot.slane %v1067_v44, 4  ;;  %v1005_v41 = vadd.f32 %v1004_v26, %v1003_v31  ;;  %v1016_v0 = vadd.f32 %v1015_v35, %v1014_v24  ;;  %v1075_v14 = vadd.f32 %v2475_v39, %v2530_v42  ;;  %v3102_v35 = vld [vmem:[#allocation38_spill] sm:$0xff] }
 0x255   : > { %v1047_v4 = vadd.f32 %v1046_v25, %v1045_v57  ;;  %v1027_v21 = vadd.f32 %v1026_v40, %v1025_v58  ;;  %v1038_v7 = vadd.f32 %v1037_v51, %v1036_v63  ;;  %v1058_v49 = vadd.f32 %v1057_v6, %v1056_v60  ;;  %v3099_v63 = vld [vmem:[#allocation10_spill] sm:$0xff]  ;;  %v3100_v60 = vld [vmem:[#allocation25_spill] sm:$0xff]  ;;  %v3103_v40 = vld [vmem:[#allocation11_spill] sm:$0xff] }
 0x256   : > { %v1069_v50 = vadd.f32 %v1068_v19, %v1067_v44  ;;  %v1006_v22 = vrot.slane %v1005_v41, 1  ;;  %v1076_v53 = vadd.f32 %v1075_v14, %v2613_v45  ;;  %v1077_v23 = vsel %vm999_vm14, %v945_v43, 0.0  ;;  %v3101_v43 = vld [vmem:[#allocation29_spill] sm:$0xff]  ;;  %v3104_v51 = vld [vmem:[#allocation26_spill] sm:$0xff] }
 0x257   : > { %v1048_v28 = vrot.slane %v1047_v4, 2  ;;  %v2734_v34 = vsel %vm899_vm11, %v2368_v11, 0.0  ;;  %v1017_v16 = vrot.slane %v1016_v0, 1  ;;  %v1059_v27 = vrot.slane %v1058_v49, 2  ;;  %v3106_v14 = vld [vmem:[#allocation17_spill] sm:$0xff] }
 0x258   : > { %v1070_v5 = vrot.slane %v1069_v50, 2  ;;  %v950_v39 = vsel %vm860_vm3, %v2655_v55, 0.0  ;;  %v1028_v42 = vrot.slane %v1027_v21, 1  ;;  %v1078_v2 = vadd.f32 %v1077_v23, %v1076_v53  ;;  %v3109_v53 = vld [vmem:[#allocation8_spill] sm:$0xff]  ;;  %v3110_v23 = vld [vmem:[#allocation19_spill] sm:$0xff] }
 0x259   : > { %v1049_v52 = vadd.f32 %v1048_v28, %v1047_v4  ;;  %v2744_v45 = vsel %vm900_vm1, %v2532_v61, 0.0  ;;  %v1039_v9 = vrot.slane %v1038_v7, 1  ;;  %v1060_v11 = vadd.f32 %v1059_v27, %v1058_v49  ;;  %v3107_v49 = vld [vmem:[#allocation39_spill] sm:$0xff] }
 0x25a   : > { %v2746_v12 = vadd.f32 %v1070_v5, %v1069_v50  ;;  %v2752_v36 = vsel %vm905_vm6, %v2532_v61, 0.0  ;;  %v2754_v29 = vadd.f32 %v1006_v22, %v1005_v41  ;;  %v1079_v55 = vrot.slane %v1078_v2, 4  ;;  %v3095_v61 = vld [vmem:[#allocation24_spill] sm:$0xff]  ;;  %v3108_v22 = vld [vmem:[#allocation18_spill] sm:$0xff] }
 0x25b   : > { %v1086_v46 = vadd.f32 %v2482_v38, %v2447_v1  ;;  %v2758_v17 = vadd.f32 %v1017_v16, %v1016_v0  ;;  %v1050_v20 = vrot.slane %v1049_v52, 1  ;;  %v1088_v47 = vsel %vm999_vm14, %v950_v39, 0.0  ;;  %v3096_v1 = vld [vmem:[#allocation14_spill] sm:$0xff]  ;;  %v3111_v39 = vld [vmem:[#allocation31_spill] sm:$0xff] }
 0x25c   : > { %v1096_v3 = vadd.f32 %v2391_v48, %v2210_v54  ;;  %v2763_v56 = vadd.f32 %v1028_v42, %v1027_v21  ;;  %v1080_v8 = vadd.f32 %v1079_v55, %v1078_v2  ;;  %v1107_v15 = vadd.f32 %v3095_v61, %v3094_v13  ;;  %v3098_v54 = vld [vmem:[#allocation16_spill] sm:$0xff]  ;;  %v3105_v0 = vld [vmem:[#allocation30_spill] sm:$0xff] }
 0x25d   : > { %v1087_v10 = vadd.f32 %v1086_v46, %v2581_v62  ;;  %v2768_v30 = vadd.f32 %v1039_v9, %v1038_v7  ;;  %v1061_v31 = vrot.slane %v1060_v11, 1  ;;  %v1072_v38 = vrot.slane %v2746_v12, 1  ;;  %v3113_v55 = vld [vmem:[#allocation32_spill] sm:$0xff] }
 0x25e   : > { %v1097_v24 = vadd.f32 %v1096_v3, %v3096_v1  ;;  %v1099_v58 = vsel %vm999_vm14, %v3097_v59, 0.0  ;;  %v1108_v48 = vadd.f32 %v1107_v15, %v3098_v54  ;;  %v1118_v44 = vadd.f32 %v3100_v60, %v3099_v63  ;;  %v3115_v3 = vld [vmem:[#allocation15_spill] sm:$0xff] }
 0x25f   : > { %v1089_v57 = vadd.f32 %v1088_v47, %v1087_v10  ;;  %v2777_v62 = vadd.f32 %v1050_v20, %v1049_v52  ;;  %v1110_v25 = vsel %vm999_vm14, %v3102_v35, 0.0  ;;  %v1129_v6 = vadd.f32 %v3104_v51, %v3103_v40  ;;  %v3112_v52 = vld [vmem:[#allocation40_spill] sm:$0xff]  ;;  %v3114_v20 = vld [vmem:[#allocation27_spill] sm:$0xff] }
 0x260   : > { %v1098_v26 = vadd.f32 %v1097_v24, %v3101_v43  ;;  %v1081_v19 = vrot.slane %v1080_v8, 2  ;;  %v1109_v4 = vadd.f32 %v1108_v48, %v3105_v0  ;;  %v1119_v21 = vadd.f32 %v1118_v44, %v3106_v14  ;;  %v3116_v10 = vld [vmem:[#allocation20_spill] sm:$0xff]  ;;  %v3118_v48 = vld [vmem:[#allocation34_spill] sm:$0xff]  ;;  %v3119_v40 = vld [vmem:[#allocation35_spill] sm:$0xff] }
 0x261   : > { %v1090_v41 = vrot.slane %v1089_v57, 4  ;;  %v1121_v50 = vsel %vm999_vm14, %v3107_v49, 0.0  ;;  %v1130_v28 = vadd.f32 %v1129_v6, %v3108_v22  ;;  %v1140_v16 = vadd.f32 %v3110_v23, %v3109_v53  ;;  %v3121_v0 = vld [vmem:[#allocation21_spill] sm:$0xff] }
 0x262   : > { %v1100_v7 = vadd.f32 %v1099_v58, %v1098_v26  ;;  %v1111_v5 = vadd.f32 %v1110_v25, %v1109_v4  ;;  %v1120_v42 = vadd.f32 %v1119_v21, %v3111_v39  ;;  %v1132_v2 = vsel %vm999_vm14, %v3112_v52, 0.0  ;;  %v3117_v58 = vld [vmem:[#allocation33_spill] sm:$0xff]  ;;  %v3123_v52 = vld [vmem:[#allocation22_spill] sm:$0xff] }
 0x263   : > { %v1091_v27 = vadd.f32 %v1090_v41, %v1089_v57  ;;  %v1131_v46 = vadd.f32 %v1130_v28, %v3113_v55  ;;  %v1141_v47 = vadd.f32 %v1140_v16, %v3114_v20  ;;  %v1151_v13 = vadd.f32 %v3116_v10, %v3115_v3  ;;  %v3120_v41 = vld [vmem:[#allocation12_spill] sm:$0xff] }
 0x264   : > { %v1101_v9 = vrot.slane %v1100_v7, 4  ;;  %v1082_v61 = vadd.f32 %v1081_v19, %v1080_v8  ;;  %v1112_v15 = vrot.slane %v1111_v5, 4  ;;  %v1122_v1 = vadd.f32 %v1121_v50, %v1120_v42 }
 0x265   : > { %v1143_v24 = vsel %vm999_vm14, %v2643_v33, 0.0  ;;  %v1133_v59 = vadd.f32 %v1132_v2, %v1131_v46  ;;  %v1142_v54 = vadd.f32 %v1141_v47, %v3117_v58  ;;  %v1152_v63 = vadd.f32 %v1151_v13, %v3118_v48 }
 0x266   : > { %v1102_v57 = vadd.f32 %v1101_v9, %v1100_v7  ;;  %v1092_v60 = vrot.slane %v1091_v27, 2  ;;  %v1113_v44 = vadd.f32 %v1112_v15, %v1111_v5  ;;  %v1123_v43 = vrot.slane %v1122_v1, 4  ;;  %v3122_v5 = vld [vmem:[#allocation36_spill] sm:$0xff] }
 0x267   : > { %v1154_v26 = vsel %vm999_vm14, %v2649_v37, 0.0  ;;  %v1134_v25 = vrot.slane %v1133_v59, 4  ;;  %v1144_v8 = vadd.f32 %v1143_v24, %v1142_v54  ;;  %v1153_v51 = vadd.f32 %v1152_v63, %v3119_v40 }
 0x268   : > { %v1103_v35 = vrot.slane %v1102_v57, 2  ;;  %v2805_v6 = vadd.f32 %v1061_v31, %v1060_v11  ;;  %v1114_v33 = vrot.slane %v1113_v44, 2  ;;  %v1124_v19 = vadd.f32 %v1123_v43, %v1122_v1 }
 0x269   : > { %v1163_v4 = vadd.f32 %v3121_v0, %v3120_v41  ;;  %v1135_v21 = vadd.f32 %v1134_v25, %v1133_v59  ;;  %v1145_v7 = vrot.slane %v1144_v8, 4  ;;  %v1155_v49 = vadd.f32 %v1154_v26, %v1153_v51 }
 0x26a   : > { %v1104_v14 = vadd.f32 %v1103_v35, %v1102_v57  ;;  %v2810_v50 = vadd.f32 %v1072_v38, %v2746_v12  ;;  %v1083_v37 = vrot.slane %v1082_v61, 1  ;;  %v1093_v22 = vadd.f32 %v1092_v60, %v1091_v27  ;;  %v3125_v57 = vld [vmem:[#allocation23_spill] sm:$0xff]  ;;  %v3126_v60 = vld [vmem:[#allocation28_spill] sm:$0xff] }
 0x26b   : > { %v1125_v28 = vrot.slane %v1124_v19, 2  ;;  %v1115_v53 = vadd.f32 %v1114_v33, %v1113_v44  ;;  %v1136_v23 = vrot.slane %v1135_v21, 2  ;;  %v1146_v16 = vadd.f32 %v1145_v7, %v1144_v8 }
 0x26c   : > { %v1156_v11 = vrot.slane %v1155_v49, 4  ;;  %v1164_v39 = vadd.f32 %v1163_v4, %v3122_v5  ;;  %v1165_v42 = vsel %vm999_vm14, %v2661_v18, 0.0  ;;  %v1174_v2 = vadd.f32 %v3123_v52, %v2667_v32  ;;  %v3124_v32 = vld [vmem:[#allocation13_spill] sm:$0xff] }
 0x26d   : > { %v1126_v31 = vadd.f32 %v1125_v28, %v1124_v19  ;;  %v1105_v9 = vrot.slane %v1104_v14, 1  ;;  %v1137_v55 = vadd.f32 %v1136_v23, %v1135_v21  ;;  %v1147_v12 = vrot.slane %v1146_v16, 2 }
 0x26e   : > { %v1157_v38 = vadd.f32 %v1156_v11, %v1155_v49  ;;  %v2817_v46 = vadd.f32 %v1083_v37, %v1082_v61  ;;  %v1166_v20 = vadd.f32 %v1165_v42, %v1164_v39  ;;  %v1175_v47 = vadd.f32 %v1174_v2, %v2734_v34 }
 0x26f   : > { %v1127_v27 = vrot.slane %v1126_v31, 1  ;;  %v1094_v3 = vrot.slane %v1093_v22, 1  ;;  %v1148_v10 = vadd.f32 %v1147_v12, %v1146_v16  ;;  %v1176_v15 = vsel %vm999_vm14, %v2744_v45, 0.0 }
 0x270   : > { %v1158_v13 = vrot.slane %v1157_v38, 2  ;;  %v1116_v18 = vrot.slane %v1115_v53, 1  ;;  %v1167_v1 = vrot.slane %v1166_v20, 4  ;;  %v1177_v24 = vadd.f32 %v1176_v15, %v1175_v47 }
 0x271   : > { %v1185_v59 = vadd.f32 %v3125_v57, %v3124_v32  ;;  %v2824_v58 = vadd.f32 %v1105_v9, %v1104_v14  ;;  %v2826_v61 = vadd.f32 %v1127_v27, %v1126_v31  ;;  %v1138_v54 = vrot.slane %v1137_v55, 1 }
 0x272   : > { %v1187_v34 = vsel %vm999_vm14, %v2752_v36, 0.0  ;;  %v1168_v48 = vadd.f32 %v1167_v1, %v1166_v20  ;;  %v1178_v63 = vrot.slane %v1177_v24, 4  ;;  %v1195_v45 = vmax.f32 %v2754_v29, %v2763_v56 }
 0x273   : > { %v1186_v44 = vadd.f32 %v1185_v59, %v3126_v60  ;;  %v2833_v43 = vadd.f32 %v1094_v3, %v1093_v22  ;;  %v1149_v26 = vrot.slane %v1148_v10, 1  ;;  %v1159_v35 = vadd.f32 %v1158_v13, %v1157_v38 }
 0x274   : > { %v1196_v25 = vmax.f32 %v2758_v17, %v2768_v30  ;;  %v1169_v8 = vrot.slane %v1168_v48, 2  ;;  %v1179_v40 = vadd.f32 %v1178_v63, %v1177_v24  ;;  %v1197_v33 = vmax.f32 %v1195_v45, %v2777_v62 }
 0x275   : > { %v1188_v51 = vadd.f32 %v1187_v34, %v1186_v44  ;;  %v2838_v36 = vadd.f32 %v1116_v18, %v1115_v53  ;;  %v2840_v19 = vadd.f32 %v1138_v54, %v1137_v55  ;;  %v1203_v0 = vmax.f32 %v2824_v58, %v2826_v61 }
 0x276   : > { %v1198_v41 = vmax.f32 %v1196_v25, %v2805_v6  ;;  %v1170_v4 = vadd.f32 %v1169_v8, %v1168_v48  ;;  %v1180_v14 = vrot.slane %v1179_v40, 2  ;;  %v1199_v7 = vmax.f32 %v1197_v33, %v2810_v50 }
 0x277   : > { %v1189_v21 = vrot.slane %v1188_v51, 4  ;;  %v2846_v49 = vadd.f32 %v1149_v26, %v1148_v10  ;;  %v1160_v37 = vrot.slane %v1159_v35, 1  ;;  %v1204_v5 = vmax.f32 %v2838_v36, %v2840_v19 }
 0x278   : > { %v1200_v22 = vmax.f32 %v1198_v41, %v2817_v46  ;;  %v1171_v28 = vrot.slane %v1170_v4, 1  ;;  %v1181_v53 = vadd.f32 %v1180_v14, %v1179_v40  ;;  %v1201_v16 = vmax.f32 %v1199_v7, %v2833_v43 }
 0x279   : > { %v1190_v23 = vadd.f32 %v1189_v21, %v1188_v51  ;;  %v1205_v39 = vmax.f32 %v1203_v0, %v2846_v49  ;;  %v2855_v52 = vadd.f32 %v1160_v37, %v1159_v35  ;;  %vm1284_vm12 = vcmask 1041409  }
 0x27a   : > { %v2850_v31 = vmax.f32 %v1201_v16, %v1200_v22  ;;  %v1182_v42 = vrot.slane %v1181_v53, 1  ;;  %v2857_v2 = vadd.f32 %v1171_v28, %v1170_v4  ;;  %vm1287_vm14 = vcmask 1042434  }
 0x27b   : > { %v1191_v11 = vrot.slane %v1190_v23, 2  ;;  %v1206_v3 = vmax.f32 %v1204_v5, %v2855_v52  ;;  %vm1290_vm2 = vcmask 1043459   ;;  %vm1293_vm13 = vcmask 1044484  }
 0x27c   : > { %v1211_v55 = vsub.f32 %v2754_v29, %v2850_v31  ;;  %v1212_v12 = vsub.f32 %v2758_v17, %v2850_v31  ;;  %v1213_v38 = vsub.f32 %v2763_v56, %v2850_v31  ;;  %v1214_v27 = vsub.f32 %v2768_v30, %v2850_v31 }
 0x27d   : > { %v1192_v9 = vadd.f32 %v1191_v11, %v1190_v23  ;;  %v1215_v20 = vsub.f32 %v2777_v62, %v2850_v31  ;;  %v1207_v10 = vmax.f32 %v1205_v39, %v2857_v2  ;;  %v2871_v13 = vadd.f32 %v1182_v42, %v1181_v53 }
 0x27e   : > { %v1229_v15 = vmul.f32 1.442695, %v1211_v55  ;;  %v1231_v18 = vmul.f32 1.442695, %v1212_v12  ;;  %v1216_v56 = vsub.f32 %v2805_v6, %v2850_v31  ;;  %v1233_v1 = vmul.f32 1.442695, %v1213_v38 }
 0x27f   : > { %v1193_v47 = vrot.slane %v1192_v9, 1  ;;  %v1235_v30 = vmul.f32 1.442695, %v1214_v27  ;;  %v1217_v62 = vsub.f32 %v2810_v50, %v2850_v31  ;;  %v1218_v24 = vsub.f32 %v2817_v46, %v2850_v31 }
 0x280   : > { %1737 = vpow2.f32 %v1229_v15  ;;  %v1237_v32 = vmul.f32 1.442695, %v1215_v20  ;;  %v1208_v57 = vmax.f32 %v1206_v3, %v2871_v13  ;;  %v1219_v6 = vsub.f32 %v2833_v43, %v2850_v31 }
 0x281   : > { %v2873_v17 = vadd.f32 %v1193_v47, %v1192_v9  ;;  %1739 = vpow2.f32 %v1231_v18  ;;  %v1239_v50 = vmul.f32 1.442695, %v1216_v56  ;;  %v1241_v46 = vmul.f32 1.442695, %v1217_v62 }
 0x282   : > { %1741 = vpow2.f32 %v1233_v1  ;;  %v1243_v34 = vmul.f32 1.442695, %v1218_v24  ;;  %vm1353_vm7 = vcmp.ge.f32.partialorder %v2754_v29, %v2850_v31  ;;  %v1245_v26 = vmul.f32 1.442695, %v1219_v6 }
 0x283   : > { %v1209_v59 = vmax.f32 %v1207_v10, %v2873_v17  ;;  %1743 = vpow2.f32 %v1235_v30  ;;  %vm1296_vm4 = vcmask 1045509  }
 0x284   : > { %1745 = vpow2.f32 %v1237_v32 }
 0x285   : > { %v2888_v54 = vmax.f32 %v1209_v59, %v1208_v57  ;;  %1747 = vpow2.f32 %v1239_v50 }
 0x286   : > { %v1738_v45 = vpop.eup %1737  ;;  %1749 = vpow2.f32 %v1241_v46 }
 0x287   : > { %v1220_v48 = vsub.f32 %v2824_v58, %v2888_v54  ;;  %v1221_v63 = vsub.f32 %v2838_v36, %v2888_v54  ;;  %v1222_v60 = vsub.f32 %v2826_v61, %v2888_v54  ;;  %v1223_v44 = vsub.f32 %v2840_v19, %v2888_v54  ;;  %v1740_v35 = vpop.eup %1739 }
 0x288   : > { %v1224_v43 = vsub.f32 %v2846_v49, %v2888_v54  ;;  %v1225_v25 = vsub.f32 %v2855_v52, %v2888_v54  ;;  %v1226_v61 = vsub.f32 %v2857_v2, %v2888_v54  ;;  %v1742_v40 = vpop.eup %1741  ;;  %v1227_v51 = vsub.f32 %v2871_v13, %v2888_v54 }
 0x289   : > { %v1247_v8 = vmul.f32 1.442695, %v1220_v48  ;;  %v1249_v33 = vmul.f32 1.442695, %v1221_v63  ;;  %v1876_v36 = vmov 0.0   ;;  %v1744_v41 = vpop.eup %1743  ;;  %v1228_v0 = vsub.f32 %v2873_v17, %v2888_v54 }
 0x28a   : > { %v1587_v19 = vsel %vm1353_vm7, 1.0, %v1876_v36  ;;  %1751 = vpow2.f32 %v1243_v34  ;;  %v1251_v4 = vmul.f32 1.442695, %v1222_v60  ;;  %v1253_v14 = vmul.f32 1.442695, %v1223_v44  ;;  %v1746_v21 = vpop.eup %1745 }
 0x28b   : > { %1753 = vpow2.f32 %v1245_v26  ;;  %v1255_v7 = vmul.f32 1.442695, %v1224_v43  ;;  %v1283_v49 = vrot.slane %v1740_v35, 7  ;;  %v1286_v37 = vrot.slane %v1742_v40, 6  ;;  %v1748_v11 = vpop.eup %1747 }
 0x28c   : > { %1755 = vpow2.f32 %v1247_v8  ;;  %v1257_v22 = vmul.f32 1.442695, %v1225_v25  ;;  %v1259_v28 = vmul.f32 1.442695, %v1226_v61  ;;  %vm1354_vm9 = vcmp.ge.f32.partialorder %v2824_v58, %v2888_v54  ;;  %v1750_v52 = vpop.eup %1749 }
 0x28d   : > { %1757 = vpow2.f32 %v1249_v33  ;;  %v1285_v53 = vsel %vm1284_vm12, %v1283_v49, %v1738_v45  ;;  %v1289_v23 = vrot.slane %v1744_v41, 5  ;;  %v1588_v16 = vsel %vm1354_vm9, 1.0, %v1876_v36 }
 0x28e   : > { %1759 = vpow2.f32 %v1251_v4  ;;  %v1288_v5 = vsel %vm1287_vm14, %v1286_v37, %v1285_v53  ;;  %v1292_v39 = vrot.slane %v1746_v21, 4  ;;  %v1361_v42 = vsel %vm1284_vm12, %v1588_v16, %v1587_v19 }
 0x28f   : > { %1761 = vpow2.f32 %v1253_v14  ;;  %v1261_v2 = vmul.f32 1.442695, %v1227_v51  ;;  %v1291_v9 = vsel %vm1290_vm2, %v1289_v23, %v1288_v5  ;;  %v1295_v55 = vrot.slane %v1748_v11, 3  ;;  %1363 = vst [vmem:[%s294_s9] sm:$0x3] %v1361_v42 }
 0x290   : > { %v1752_v12 = vpop.eup %1751  ;;  %1763 = vpow2.f32 %v1255_v7  ;;  %v1263_v38 = vmul.f32 1.442695, %v1228_v0  ;;  %v1294_v27 = vsel %vm1293_vm13, %v1292_v39, %v1291_v9  ;;  %v1298_v20 = vrot.slane %v1750_v52, 2 }
 0x291   : > { %1804 = shalt.err (!%p1801_p3)
}
 0x292   : > { %1627 = dma.vmem_to_hbm [thread:$0]  (%p1947_p5), %s2925_s10, 32, %s1399_s12, %s1370_s13   ;;  %v1754_v47 = vpop.eup %1753  ;;  %1765 = vpow2.f32 %v1257_v22  ;;  %v1297_v3 = vsel %vm1296_vm4, %v1295_v55, %v1294_v27  ;;  %vm1299_vm10 = vcmask 1046534   ;;  %v1301_v10 = vrot.slane %v1752_v12, 1 }
 0x293   : > { %v1756_v13 = vpop.eup %1755  ;;  %1767 = vpow2.f32 %v1259_v28  ;;  %v1300_v15 = vsel %vm1299_vm10, %v1298_v20, %v1297_v3  ;;  %vm1302_vm5 = vcmask 1047559   ;;  %vm1322_vm0 = vcmask 1040384   ;;  %s1380_s9 = scalar_lea.hbm %s3004_s5, %s1960_s11  ;;  %s287_s10 = scalar_lea.vmem [#allocation2], %s1519_s20 }
 0x294   : > { %v1758_v18 = vpop.eup %1757  ;;  %1769 = vpow2.f32 %v1261_v2  ;;  %v1303_v17 = vsel %vm1302_vm5, %v1301_v10, %v1300_v15  ;;  %v1323_v56 = vsel %vm1322_vm0, %v1754_v47, 0.0  ;;  %s1382_s12 = sshll.u32 %s287_s10, 4  ;;  %s1384_s13 = sshll.u32 %s1380_s9, 4  ;;  %s1383_s12 = int_to_ptr.vmem [resolvable:$true] %s1382_s12  ;;  %s1385_s13 = int_to_ptr.hbm [resolvable:$true] %s1384_s13 }
 0x295   : > { %v1760_v1 = vpop.eup %1759  ;;  %1771 = vpow2.f32 %v1263_v38  ;;  %v1304_v30 = vrot.slane %v1758_v18, 7  ;;  %v1324_v62 = vadd.f32 %v1323_v56, %v1303_v17  ;;  %s1365_s15 = scalar_lea.sflag [#allocation3], %s2884_s14  ;;  %s1819_s16 = sshra.s32 %s1385_s13, 4  ;;  %s1820_s16 = int_to_ptr.hbm [resolvable:$true] %s1819_s16 }
 0x296   : > { %v1762_v24 = vpop.eup %1761  ;;  %v1306_v32 = vrot.slane %v1760_v1, 6  ;;  %s1821_s11 = scalar_lea.hbm %s1820_s16, 2  ;;  %s1825_s20 = scalar_lea.hbm %s3004_s5, 4 }
 0x297   : > { %v1764_v57 = vpop.eup %1763  ;;  %v1305_v59 = vsel %vm1284_vm12, %v1304_v30, %v1756_v13  ;;  %v1308_v6 = vrot.slane %v1762_v24, 5  ;;  %v1325_v50 = vrot.slane %v1324_v62, 4  ;;  %p1822_p4 = scmp.ne.s32.totalorder %s1820_s16, %s1821_s11  ;;  %p1826_p9 = scmp.lt.s32.totalorder %s1820_s16, %s3004_s5 }
 0x298   : > { %v1766_v46 = vpop.eup %1765  ;;  %v1307_v34 = vsel %vm1287_vm14, %v1306_v32, %v1305_v59  ;;  %v1310_v48 = vrot.slane %v1764_v57, 4  ;;  %p1827_p10 = scmp.lt.s32.totalorder %s1825_s20, %s1821_s11 }
 0x299   : > { %v1768_v63 = vpop.eup %1767  ;;  %v1309_v60 = vsel %vm1290_vm2, %v1308_v6, %v1307_v34  ;;  %v1312_v44 = vrot.slane %v1766_v46, 3  ;;  %v1326_v45 = vadd.f32 %v1325_v50, %v1324_v62  ;;  %p1823_p7 = pnand %p1822_p4, %p1947_p5 }
 0x29a   : > { %v1770_v43 = vpop.eup %1769  ;;  %v1311_v26 = vsel %vm1293_vm13, %v1310_v48, %v1309_v60  ;;  %v1314_v35 = vrot.slane %v1768_v63, 2  ;;  %p1828_p11 = por %p1827_p10, %p1826_p9 }
 0x29b   : > { %v1772_v25 = vpop.eup %1771  ;;  %v1313_v61 = vsel %vm1296_vm4, %v1312_v44, %v1311_v26  ;;  %v1316_v8 = vrot.slane %v1770_v43, 1  ;;  %v1327_v40 = vrot.slane %v1326_v45, 2  ;;  %p1824_p8 = pneg %p1823_p7 }
 0x29c   : > { %v1315_v51 = vsel %vm1299_vm10, %v1314_v35, %v1313_v61  ;;  %v1331_v19 = vsel %vm1322_vm0, %v1772_v25, 0.0 }
 0x29d   : > { %v1317_v33 = vsel %vm1302_vm5, %v1316_v8, %v1315_v51  ;;  %v1328_v36 = vadd.f32 %v1327_v40, %v1326_v45  ;;  %p1829_p12 = pnand %p1828_p11, %p1824_p8 }
 0x29e   : > { %v1332_v41 = vadd.f32 %v1331_v19, %v1317_v33 }
 0x29f   : > { %v1329_v0 = vrot.slane %v1328_v36, 1 }
 0x2a0   : > { %v1333_v4 = vrot.slane %v1332_v41, 4 }
 0x2a1   : > { %v1330_v14 = vadd.f32 %v1329_v0, %v1328_v36 }
 0x2a2   : > { %v1334_v21 = vadd.f32 %v1333_v4, %v1332_v41 }
 0x2a3   : > { %1773 = vlog2.f32 %v1330_v14 }
 0x2a4   : > { %v1335_v7 = vrot.slane %v1334_v21, 2 }
 0x2a6   : > { %v1336_v49 = vadd.f32 %v1335_v7, %v1334_v21 }
 0x2a8   : > { %v1337_v37 = vrot.slane %v1336_v49, 1 }
 0x2a9   : > { %v1774_v28 = vpop.eup %1773 }
 0x2aa   : > { %v1338_v22 = vadd.f32 %v1337_v37, %v1336_v49  ;;  %v1340_v53 = vmul.f32 0.6931472, %v1774_v28 }
 0x2ac   : > { %1775 = vlog2.f32 %v1338_v22  ;;  %v1343_v11 = vadd.f32 %v1340_v53, %v2850_v31 }
 0x2ae   : > { %v1345_v39 = vsub.f32 %v1343_v11, %v2754_v29 }
 0x2b2   : > { %v1776_v23 = vpop.eup %1775 }
 0x2b3   : > { %v1342_v16 = vmul.f32 0.6931472, %v1776_v23 }
 0x2b5   : > { %v1344_v5 = vadd.f32 %v1342_v16, %v2888_v54 }
 0x2b7   : > { %v1346_v42 = vsub.f32 %v1344_v5, %v2824_v58 }
 0x2b9   : > { %v1349_v52 = vrot.slane %v1346_v42, 7 }
 0x2bb   : > { %v1350_v31 = vsel %vm1284_vm12, %v1349_v52, %v1345_v39 }
 0x2bc   : > { %1352 = vst [vmem:[%s287_s10] sm:$0x3] %v1350_v31 }
 0x2bd   : > { %1832 = shalt.err (!%p1829_p12)
}
 0x2be   : > { %1626 = dma.vmem_to_hbm [thread:$0]  (%p1947_p5), %s1383_s12, 32, %s1385_s13, %s1365_s15  }
 0x2bf PF: > { %p1637_p13 = scmp.ge.s32.totalorder %s1871_s24, 2  ;;  %s1410_s14 = sand.u32 1, %s1859_s21  }
 0x2c0   : > { %s1411_s26 = scalar_lea.sflag [#allocation3], %s1410_s14 }
 0x2c1   : > { %p1631_p0 = pnand %p1637_p13, %p1951_p6 }
 0x2c3   : > { %p1632_p1 = pneg %p1631_p0 }
 0x2c5   : > { %1850 = dma.done.wait (%p1632_p1), %s1411_s26, 32  }
 0x2c6   : > { %1852 = vsyncadd (%p1632_p1), %s1411_s26, 4294967264  ;;  %s1421_s28 = scalar_lea.sflag [#allocation5], %s1410_s14 }
 0x2c7   : > { %1854 = dma.done.wait (%p1632_p1), %s1421_s28, 32  }
 0x2c8   : > { %1856 = vsyncadd (%p1632_p1), %s1421_s28, 4294967264  ;;  %p20_p5 = scmp.ge.s32.totalorder %s1935_s27, 4   ;;  %s3127_s21 = smov %s1863_s22 }
 0x2c9   : > { %s3128_s22 = smov %s1867_s23  ;;  %s3129_s23 = smov %s1945_s30 }
 0x2ca   : > { %s3130_s24 = smov %s1935_s27  ;;  %22 = sbr.rel (!%p20_p5) target bundleno = 5 (0x5), region = 98 }
 0x2cf   :  { %1427 = vsyncpa [#allocation3], 1 }
 0x2d0   :  { %1429 = vsyncpa [#allocation3 + $0x1], 1 }
 0x2d1   :  { %1430 = vsyncpa [#allocation5], 1 }
 0x2d2   :  { %1432 = vsyncpa [#allocation5 + $0x1], 1 }

</bundles_post_ra>
